<compile_context>
chip_gen: v6e
topology: v6e:2x2x1
jax: 0.10.0
libtpu: 0.0.40
codegen_flags: <defaults>
</compile_context>

<pallas_src>
import jax
import jax.numpy as jnp
import numpy as np
from jax.experimental import pallas as pl
from jax.experimental.pallas import tpu as pltpu

KSIZE = 7
PAD = (KSIZE - 1) // 2   # 3
TOP = 8                  # sublane-aligned start row of the conv-scratch interior


# ---------------------------------------------------------------------------
# Pass 1: channel pool -> 7x7 conv (BN folded) -> sigmoid  => scale map.
# ---------------------------------------------------------------------------
def _scale_map_kernel(w_ref, x_ref, s_ref, pad_ref):
    # w_ref  : SMEM (2*49 + 1,)  BN-folded conv weights followed by BN offset
    # x_ref  : VMEM (NB, C, H, W)
    # s_ref  : VMEM (NB, H, W)   f32 sigmoid attention map
    # pad_ref: VMEM (2, TOP+H+PAD, W+2*PAD) f32 zero-padded pooled maps
    NB, C, H, W = x_ref.shape
    Wp = W + 2 * PAD
    f32 = jnp.float32

    # Channel-pool chunk size: largest divisor of C that is <= 8.
    CB = max(d for d in range(1, min(C, 8) + 1) if C % d == 0)
    nchunks = C // CB

    # Zero the padded scratch once; per-image writes fully overwrite the
    # interior each iteration, so the zero borders stay valid.
    pad_ref[...] = jnp.zeros_like(pad_ref)

    def _chunk_pool(xc):
        # xc: (CB, H, W) value. Pure elementwise merges (no cross-lane work).
        cm = xc[0]
        cs = xc[0].astype(f32)
        for j in range(1, CB):
            cm = jnp.maximum(cm, xc[j])
            cs = cs + xc[j].astype(f32)
        return cm, cs

    for nb in range(NB):
        # ---- ChannelPool: streaming max (input dtype) + sum (f32), chunked.
        m, s = _chunk_pool(x_ref[nb, pl.ds(0, CB)])

        def pool_body(i, carry, nb=nb):
            m, s = carry
            c0 = pl.multiple_of(i * CB, CB)
            cm, cs = _chunk_pool(x_ref[nb, pl.ds(c0, CB)])
            return jnp.maximum(m, cm), s + cs

        m, s = jax.lax.fori_loop(1, nchunks, pool_body, (m, s),
                                 unroll=True if nchunks <= 8 else 4)
        x_max = m.astype(f32)
        x_mean = s * (1.0 / C)

        # ---- Write pooled maps into the zero-padded scratch interior
        #      (sublane-aligned row TOP; no lane-axis concatenate).
        pad_ref[0, TOP:TOP + H, PAD:PAD + W] = x_max
        pad_ref[1, TOP:TOP + H, PAD:PAD + W] = x_mean

        # ---- 7x7 conv, 2 -> 1 channel, accumulator-shifted formulation:
        #      14 (c, kh) row bands -> 7 padded-width partial sums A_kw ->
        #      7 lane slices.  BN offset (w_ref[98]) added at the end.
        accs = [jnp.zeros((H, Wp), f32) for _ in range(KSIZE)]
        for c in range(2):
            for kh in range(KSIZE):
                band = pad_ref[c, TOP - PAD + kh:TOP - PAD + kh + H, :]
                for kw in range(KSIZE):
                    wv = w_ref[c * KSIZE * KSIZE + kh * KSIZE + kw]
                    accs[kw] = accs[kw] + band * wv
        acc = accs[0][:, 0:W]
        for kw in range(1, KSIZE):
            acc = acc + accs[kw][:, kw:kw + W]
        acc = acc + w_ref[2 * KSIZE * KSIZE]

        s_ref[nb] = jax.nn.sigmoid(acc)


# ---------------------------------------------------------------------------
# Pass 2: lane-dense rescale  o[n, c, :] = x[n, c, :] * scale[n, :].
# ---------------------------------------------------------------------------
def _rescale_kernel(s_ref, x_ref, o_ref):
    # s_ref: (NB, 1, HW) f32 ; x_ref / o_ref: (NB, CB, HW) in x.dtype
    NB = x_ref.shape[0]
    for nb in range(NB):
        sc = s_ref[nb]                                   # (1, HW) f32
        if o_ref.dtype == jnp.float32:
            o_ref[nb] = x_ref[nb] * sc
        else:
            # bf16/f16 inputs: multiply in the input dtype (native on v6e/v7x).
            o_ref[nb] = x_ref[nb] * sc.astype(o_ref.dtype)


# ---------------------------------------------------------------------------
# Wrapper helpers.
# ---------------------------------------------------------------------------
def _tiled_bytes(shape, itemsize):
    """Upper bound on the VMEM footprint of a block ((8,128) tile padding)."""
    s = list(shape)
    if len(s) >= 1:
        s[-1] = -(-s[-1] // 128) * 128
    if len(s) >= 2:
        s[-2] = -(-s[-2] // 8) * 8
    n = 1
    for d in s:
        n *= d
    return n * itemsize


def _vmem_limit(required_bytes):
    """Explicit VMEM budget, capped by the device's physical capacity."""
    try:
        cap = getattr(pltpu.get_tpu_info(), "vmem_capacity_bytes", 64 << 20)
    except Exception:
        cap = 64 << 20           # v7x lower bound; v5e/v6e have 128 MiB
    ceiling = cap - (4 << 20)
    return int(max(1 << 20, min(ceiling, max(required_bytes, 32 << 20))))


def _pick_batch_block(n, per_item_bytes, target_bytes):
    """Largest NB dividing n with NB*per_item_bytes <= target; keep the grid
    length >= 2 when n >= 2 so the 'parallel' axis still feeds both v7x cores."""
    best = 1
    for d in range(1, n + 1):
        if n % d:
            continue
        if d * per_item_bytes > target_bytes:
            continue
        if n >= 2 and n // d < 2:
            continue
        best = d
    return best


def _pick_channel_block(c, row_bytes, target_bytes):
    """Full C if it fits; otherwise the largest multiple-of-8 divisor of C that
    fits (the second-minor block dim must be a multiple of 8 or the full dim)."""
    if c * row_bytes <= target_bytes:
        return c
    best = None
    for cb in range(8, c, 8):
        if c % cb == 0 and cb * row_bytes <= target_bytes:
            best = cb
    return best if best is not None else c


def spatial_attention(x, conv_w, bn_gamma, bn_beta, bn_mean, bn_var, eps=1e-5):
    """x: (N, C, H, W); conv_w: (1, 2, 7, 7); BN params: (1,) each."""
    N, C, H, W = x.shape
    HW = H * W
    Wp = W + 2 * PAD
    itemsize = x.dtype.itemsize

    # Fold inference BatchNorm into the conv:
    #   bn(conv(p)) = conv(p) * g/sqrt(v+eps) + (b - m*g/sqrt(v+eps))
    bn_scale = bn_gamma / jnp.sqrt(bn_var + eps)              # (1,)
    w_folded = (conv_w[0] * bn_scale[0]).reshape(-1)          # (2*7*7,)
    offset = bn_beta - bn_mean * bn_scale                     # (1,)
    w_smem = jnp.concatenate([w_folded, offset]).astype(jnp.float32)

    # ----------------- Pass 1: per-image sigmoid attention map -------------
    per_image = _tiled_bytes((C, H, W), itemsize)
    nb1 = _pick_batch_block(N, per_image, 2 << 20)
    req1 = (2 * nb1 * per_image
            + 2 * _tiled_bytes((nb1, H, W), 4)
            + _tiled_bytes((2, TOP + H + PAD, Wp), 4)
            + KSIZE * _tiled_bytes((H, Wp), 4)
            + (4 << 20))

    scale = pl.pallas_call(
        _scale_map_kernel,
        out_shape=jax.ShapeDtypeStruct((N, H, W), jnp.float32),
        grid_spec=pltpu.PrefetchScalarGridSpec(
            num_scalar_prefetch=0,
            grid=(N // nb1,),
            in_specs=[
                pl.BlockSpec(memory_space=pltpu.MemorySpace.SMEM),
                pl.BlockSpec((nb1, C, H, W), lambda n: (n, 0, 0, 0)),
            ],
            out_specs=pl.BlockSpec((nb1, H, W), lambda n: (n, 0, 0)),
            scratch_shapes=[
                pltpu.VMEM((2, TOP + H + PAD, Wp), jnp.float32),
            ],
        ),
        compiler_params=pltpu.CompilerParams(
            dimension_semantics=("parallel",),
            vmem_limit_bytes=_vmem_limit(req1)),
    )(w_smem, x)

    # ----------------- Pass 2: lane-dense rescale o = x * scale ------------
    x3 = x.reshape(N, C, HW)          # free: NCHW is contiguous
    s3 = scale.reshape(N, 1, HW)      # free

    cb = _pick_channel_block(C, HW * itemsize, 1 << 20)
    nb2 = _pick_batch_block(N, _tiled_bytes((cb, HW), itemsize), 1 << 20)
    req2 = (4 * _tiled_bytes((nb2, cb, HW), itemsize)
            + 2 * _tiled_bytes((nb2, 1, HW), 4)
            + (2 << 20))

    out3 = pl.pallas_call(
        _rescale_kernel,
        out_shape=jax.ShapeDtypeStruct((N, C, HW), x.dtype),
        grid_spec=pltpu.PrefetchScalarGridSpec(
            num_scalar_prefetch=0,
            grid=(N // nb2, C // cb),
            in_specs=[
                pl.BlockSpec((nb2, 1, HW), lambda n, c: (n, 0, 0)),
                pl.BlockSpec((nb2, cb, HW), lambda n, c: (n, c, 0)),
            ],
            out_specs=pl.BlockSpec((nb2, cb, HW), lambda n, c: (n, c, 0)),
        ),
        compiler_params=pltpu.CompilerParams(
            dimension_semantics=("parallel", "parallel"),
            vmem_limit_bytes=_vmem_limit(req2)),
    )(s3, x3)

    return out3.reshape(N, C, H, W)


# ---------------------------------------------------------------------------
# Pure-JAX reference (PyTorch forward, BN in eval mode).
# ---------------------------------------------------------------------------
def ref_forward(x, conv_w, bn_gamma, bn_beta, bn_mean, bn_var, eps=1e-5):
    x_max = jnp.max(x, axis=1, keepdims=True)
    x_mean = jnp.mean(x, axis=1, keepdims=True)
    pooled = jnp.concatenate([x_max, x_mean], axis=1)        # (N, 2, H, W)
    y = jax.lax.conv_general_dilated(
        pooled, conv_w, window_strides=(1, 1),
        padding=[(PAD, PAD), (PAD, PAD)],
        dimension_numbers=("NCHW", "OIHW", "NCHW"))
    y = (y - bn_mean[None, :, None, None]) / jnp.sqrt(
        bn_var[None, :, None, None] + eps)
    y = y * bn_gamma[None, :, None, None] + bn_beta[None, :, None, None]
    scale = jax.nn.sigmoid(y)
    return x * scale


if __name__ == "__main__":
    key = jax.random.PRNGKey(0)
    k1, k2 = jax.random.split(key)

    N, C, H, W = 2, 4, 16, 16
    x = jax.random.normal(k1, (N, C, H, W), dtype=jnp.float32)

    # Conv2d(2, 1, kernel_size=7, bias=False) weight — deterministic init.
    conv_w = 0.05 * jax.random.normal(k2, (1, 2, KSIZE, KSIZE),
                                      dtype=jnp.float32)
    # BatchNorm2d(1) parameters at PyTorch defaults (inference semantics).
    bn_gamma = jnp.ones((1,), jnp.float32)
    bn_beta = jnp.zeros((1,), jnp.float32)
    bn_mean = jnp.zeros((1,), jnp.float32)
    bn_var = jnp.ones((1,), jnp.float32)

    out = spatial_attention(x, conv_w, bn_gamma, bn_beta, bn_mean, bn_var)
    out = jax.block_until_ready(out)

    ref = ref_forward(x, conv_w, bn_gamma, bn_beta, bn_mean, bn_var)
    np.testing.assert_allclose(np.asarray(out), np.asarray(ref),
                               rtol=1e-5, atol=1e-5)
    print("KERNEL_OK")
</pallas_src>

<mosaic_0001>
module attributes {stable_mosaic.version = 11 : i64} {
  func.func @_scale_map_kernel(%arg0: i32, %arg1: memref<99xf32, #tpu.memory_space<smem>>, %arg2: memref<1x4x16x16xf32, #tpu.memory_space<vmem>>, %arg3: memref<1x16x16xf32, #tpu.memory_space<vmem>>, %arg4: memref<2x27x22xf32, #tpu.memory_space<vmem>>) attributes {dimension_semantics = [#tpu.dimension_semantics<parallel>], iteration_bounds = array<i64: 2>, scalar_prefetch = 0 : i64, scratch_operands = 1 : i64, tpu.core_type = #tpu.core_type<tc>, window_params = [{transform_indices = @transform_0, window_bounds = array<i64: 99>}, {transform_indices = @transform_1, window_bounds = array<i64: 1, 4, 16, 16>}, {transform_indices = @transform_2, window_bounds = array<i64: 1, 16, 16>}]} {
    %cst = arith.constant 0.000000e+00 : f32
    %0 = vector.broadcast %cst : f32 to vector<2x27x22xf32>
    %c0 = arith.constant 0 : index
    %c0_0 = arith.constant 0 : index
    %c0_1 = arith.constant 0 : index
    %1 = vector.load %arg4[%c0, %c0_0, %c0_1] : memref<2x27x22xf32, #tpu.memory_space<vmem>>, vector<2x27x22xf32>
    tpu.vector_store %arg4[%c0, %c0_0, %c0_1], %0 {strides = array<i32>} : memref<2x27x22xf32, #tpu.memory_space<vmem>>, vector<2x27x22xf32>,
    %c0_2 = arith.constant 0 : index
    %c0_3 = arith.constant 0 : index
    %c0_4 = arith.constant 0 : index
    %c0_5 = arith.constant 0 : index
    %2 = vector.load %arg2[%c0_2, %c0_3, %c0_4, %c0_5] : memref<1x4x16x16xf32, #tpu.memory_space<vmem>>, vector<1x4x16x16xf32>
    %3 = vector.shape_cast %2 : vector<1x4x16x16xf32> to vector<4x16x16xf32>
    %4 = vector.extract_strided_slice %3 {offsets = [0, 0, 0], sizes = [1, 16, 16], strides = [1, 1, 1]} : vector<4x16x16xf32> to vector<1x16x16xf32>
    %5 = vector.shape_cast %4 : vector<1x16x16xf32> to vector<16x16xf32>
    %6 = vector.extract_strided_slice %3 {offsets = [0, 0, 0], sizes = [1, 16, 16], strides = [1, 1, 1]} : vector<4x16x16xf32> to vector<1x16x16xf32>
    %7 = vector.shape_cast %6 : vector<1x16x16xf32> to vector<16x16xf32>
    %8 = vector.extract_strided_slice %3 {offsets = [1, 0, 0], sizes = [1, 16, 16], strides = [1, 1, 1]} : vector<4x16x16xf32> to vector<1x16x16xf32>
    %9 = vector.shape_cast %8 : vector<1x16x16xf32> to vector<16x16xf32>
    %10 = arith.maximumf %5, %9 : vector<16x16xf32>
    %11 = vector.extract_strided_slice %3 {offsets = [1, 0, 0], sizes = [1, 16, 16], strides = [1, 1, 1]} : vector<4x16x16xf32> to vector<1x16x16xf32>
    %12 = vector.shape_cast %11 : vector<1x16x16xf32> to vector<16x16xf32>
    %13 = arith.addf %7, %12 : vector<16x16xf32>
    %14 = vector.extract_strided_slice %3 {offsets = [2, 0, 0], sizes = [1, 16, 16], strides = [1, 1, 1]} : vector<4x16x16xf32> to vector<1x16x16xf32>
    %15 = vector.shape_cast %14 : vector<1x16x16xf32> to vector<16x16xf32>
    %16 = arith.maximumf %10, %15 : vector<16x16xf32>
    %17 = vector.extract_strided_slice %3 {offsets = [2, 0, 0], sizes = [1, 16, 16], strides = [1, 1, 1]} : vector<4x16x16xf32> to vector<1x16x16xf32>
    %18 = vector.shape_cast %17 : vector<1x16x16xf32> to vector<16x16xf32>
    %19 = arith.addf %13, %18 : vector<16x16xf32>
    %20 = vector.extract_strided_slice %3 {offsets = [3, 0, 0], sizes = [1, 16, 16], strides = [1, 1, 1]} : vector<4x16x16xf32> to vector<1x16x16xf32>
    %21 = vector.shape_cast %20 : vector<1x16x16xf32> to vector<16x16xf32>
    %22 = arith.maximumf %16, %21 : vector<16x16xf32>
    %23 = vector.extract_strided_slice %3 {offsets = [3, 0, 0], sizes = [1, 16, 16], strides = [1, 1, 1]} : vector<4x16x16xf32> to vector<1x16x16xf32>
    %24 = vector.shape_cast %23 : vector<1x16x16xf32> to vector<16x16xf32>
    %25 = arith.addf %19, %24 : vector<16x16xf32>
    %c1_i32 = arith.constant 1 : i32
    %c0_i32 = arith.constant 0 : i32
    %26 = arith.addi %c1_i32, %c0_i32 : i32
    %c1_i32_6 = arith.constant 1 : i32
    %27:2 = scf.for %arg5 = %c1_i32 to %26 step %c1_i32_6 iter_args(%arg6 = %22, %arg7 = %25) -> (vector<16x16xf32>, vector<16x16xf32>)  : i32 {
      %c4_i32 = arith.constant 4 : i32
      %487 = arith.muli %arg5, %c4_i32 : i32
      %488 = tpu.assume_multiple %487, 4 : i32
      %c0_69 = arith.constant 0 : index
      %489 = arith.index_cast %488 : i32 to index
      %c0_70 = arith.constant 0 : index
      %c0_71 = arith.constant 0 : index
      %490 = vector.load %arg2[%c0_69, %489, %c0_70, %c0_71] : memref<1x4x16x16xf32, #tpu.memory_space<vmem>>, vector<1x4x16x16xf32>
      %491 = vector.shape_cast %490 : vector<1x4x16x16xf32> to vector<4x16x16xf32>
      %492 = vector.extract_strided_slice %491 {offsets = [0, 0, 0], sizes = [1, 16, 16], strides = [1, 1, 1]} : vector<4x16x16xf32> to vector<1x16x16xf32>
      %493 = vector.shape_cast %492 : vector<1x16x16xf32> to vector<16x16xf32>
      %494 = vector.extract_strided_slice %491 {offsets = [0, 0, 0], sizes = [1, 16, 16], strides = [1, 1, 1]} : vector<4x16x16xf32> to vector<1x16x16xf32>
      %495 = vector.shape_cast %494 : vector<1x16x16xf32> to vector<16x16xf32>
      %496 = vector.extract_strided_slice %491 {offsets = [1, 0, 0], sizes = [1, 16, 16], strides = [1, 1, 1]} : vector<4x16x16xf32> to vector<1x16x16xf32>
      %497 = vector.shape_cast %496 : vector<1x16x16xf32> to vector<16x16xf32>
      %498 = arith.maximumf %493, %497 : vector<16x16xf32>
      %499 = vector.extract_strided_slice %491 {offsets = [1, 0, 0], sizes = [1, 16, 16], strides = [1, 1, 1]} : vector<4x16x16xf32> to vector<1x16x16xf32>
      %500 = vector.shape_cast %499 : vector<1x16x16xf32> to vector<16x16xf32>
      %501 = arith.addf %495, %500 : vector<16x16xf32>
      %502 = vector.extract_strided_slice %491 {offsets = [2, 0, 0], sizes = [1, 16, 16], strides = [1, 1, 1]} : vector<4x16x16xf32> to vector<1x16x16xf32>
      %503 = vector.shape_cast %502 : vector<1x16x16xf32> to vector<16x16xf32>
      %504 = arith.maximumf %498, %503 : vector<16x16xf32>
      %505 = vector.extract_strided_slice %491 {offsets = [2, 0, 0], sizes = [1, 16, 16], strides = [1, 1, 1]} : vector<4x16x16xf32> to vector<1x16x16xf32>
      %506 = vector.shape_cast %505 : vector<1x16x16xf32> to vector<16x16xf32>
      %507 = arith.addf %501, %506 : vector<16x16xf32>
      %508 = vector.extract_strided_slice %491 {offsets = [3, 0, 0], sizes = [1, 16, 16], strides = [1, 1, 1]} : vector<4x16x16xf32> to vector<1x16x16xf32>
      %509 = vector.shape_cast %508 : vector<1x16x16xf32> to vector<16x16xf32>
      %510 = arith.maximumf %504, %509 : vector<16x16xf32>
      %511 = vector.extract_strided_slice %491 {offsets = [3, 0, 0], sizes = [1, 16, 16], strides = [1, 1, 1]} : vector<4x16x16xf32> to vector<1x16x16xf32>
      %512 = vector.shape_cast %511 : vector<1x16x16xf32> to vector<16x16xf32>
      %513 = arith.addf %507, %512 : vector<16x16xf32>
      %514 = arith.maximumf %arg6, %510 : vector<16x16xf32>
      %515 = arith.addf %arg7, %513 : vector<16x16xf32>
      scf.yield %514, %515 : vector<16x16xf32>, vector<16x16xf32>
    }
    %c0_i32_7 = arith.constant 0 : i32
    %cst_8 = arith.constant 2.500000e-01 : f32
    %28 = vector.broadcast %cst_8 : f32 to vector<16x16xf32>
    %29 = arith.mulf %27#1, %28 : vector<16x16xf32>
    %c0_9 = arith.constant 0 : index
    %c8 = arith.constant 8 : index
    %c3 = arith.constant 3 : index
    %30 = vector.load %arg4[%c0_9, %c8, %c3] : memref<2x27x22xf32, #tpu.memory_space<vmem>>, vector<1x16x16xf32>
    %31 = vector.shape_cast %30 : vector<1x16x16xf32> to vector<16x16xf32>
    %32 = vector.shape_cast %27#0 : vector<16x16xf32> to vector<1x16x16xf32>
    tpu.vector_store %arg4[%c0_9, %c8, %c3], %32 {strides = array<i32>} : memref<2x27x22xf32, #tpu.memory_space<vmem>>, vector<1x16x16xf32>,
    %c1 = arith.constant 1 : index
    %c8_10 = arith.constant 8 : index
    %c3_11 = arith.constant 3 : index
    %33 = vector.load %arg4[%c1, %c8_10, %c3_11] : memref<2x27x22xf32, #tpu.memory_space<vmem>>, vector<1x16x16xf32>
    %34 = vector.shape_cast %33 : vector<1x16x16xf32> to vector<16x16xf32>
    %35 = vector.shape_cast %29 : vector<16x16xf32> to vector<1x16x16xf32>
    tpu.vector_store %arg4[%c1, %c8_10, %c3_11], %35 {strides = array<i32>} : memref<2x27x22xf32, #tpu.memory_space<vmem>>, vector<1x16x16xf32>,
    %cst_12 = arith.constant 0.000000e+00 : f32
    %36 = vector.broadcast %cst_12 : f32 to vector<16x22xf32>
    %cst_13 = arith.constant 0.000000e+00 : f32
    %37 = vector.broadcast %cst_13 : f32 to vector<16x22xf32>
    %cst_14 = arith.constant 0.000000e+00 : f32
    %38 = vector.broadcast %cst_14 : f32 to vector<16x22xf32>
    %cst_15 = arith.constant 0.000000e+00 : f32
    %39 = vector.broadcast %cst_15 : f32 to vector<16x22xf32>
    %cst_16 = arith.constant 0.000000e+00 : f32
    %40 = vector.broadcast %cst_16 : f32 to vector<16x22xf32>
    %cst_17 = arith.constant 0.000000e+00 : f32
    %41 = vector.broadcast %cst_17 : f32 to vector<16x22xf32>
    %cst_18 = arith.constant 0.000000e+00 : f32
    %42 = vector.broadcast %cst_18 : f32 to vector<16x22xf32>
    %c0_19 = arith.constant 0 : index
    %c5 = arith.constant 5 : index
    %c0_20 = arith.constant 0 : index
    %43 = vector.load %arg4[%c0_19, %c5, %c0_20] : memref<2x27x22xf32, #tpu.memory_space<vmem>>, vector<1x16x22xf32>
    %44 = vector.shape_cast %43 : vector<1x16x22xf32> to vector<16x22xf32>
    %c0_21 = arith.constant 0 : index
    %45 = memref.load %arg1[%c0_21] : memref<99xf32, #tpu.memory_space<smem>>
    %46 = vector.broadcast %45 : f32 to vector<16x22xf32>
    %47 = arith.mulf %44, %46 : vector<16x22xf32>
    %48 = arith.addf %36, %47 : vector<16x22xf32>
    %c1_22 = arith.constant 1 : index
    %49 = memref.load %arg1[%c1_22] : memref<99xf32, #tpu.memory_space<smem>>
    %50 = vector.broadcast %49 : f32 to vector<16x22xf32>
    %51 = arith.mulf %44, %50 : vector<16x22xf32>
    %52 = arith.addf %37, %51 : vector<16x22xf32>
    %c2 = arith.constant 2 : index
    %53 = memref.load %arg1[%c2] : memref<99xf32, #tpu.memory_space<smem>>
    %54 = vector.broadcast %53 : f32 to vector<16x22xf32>
    %55 = arith.mulf %44, %54 : vector<16x22xf32>
    %56 = arith.addf %38, %55 : vector<16x22xf32>
    %c3_23 = arith.constant 3 : index
    %57 = memref.load %arg1[%c3_23] : memref<99xf32, #tpu.memory_space<smem>>
    %58 = vector.broadcast %57 : f32 to vector<16x22xf32>
    %59 = arith.mulf %44, %58 : vector<16x22xf32>
    %60 = arith.addf %39, %59 : vector<16x22xf32>
    %c4 = arith.constant 4 : index
    %61 = memref.load %arg1[%c4] : memref<99xf32, #tpu.memory_space<smem>>
    %62 = vector.broadcast %61 : f32 to vector<16x22xf32>
    %63 = arith.mulf %44, %62 : vector<16x22xf32>
    %64 = arith.addf %40, %63 : vector<16x22xf32>
    %c5_24 = arith.constant 5 : index
    %65 = memref.load %arg1[%c5_24] : memref<99xf32, #tpu.memory_space<smem>>
    %66 = vector.broadcast %65 : f32 to vector<16x22xf32>
    %67 = arith.mulf %44, %66 : vector<16x22xf32>
    %68 = arith.addf %41, %67 : vector<16x22xf32>
    %c6 = arith.constant 6 : index
    %69 = memref.load %arg1[%c6] : memref<99xf32, #tpu.memory_space<smem>>
    %70 = vector.broadcast %69 : f32 to vector<16x22xf32>
    %71 = arith.mulf %44, %70 : vector<16x22xf32>
    %72 = arith.addf %42, %71 : vector<16x22xf32>
    %c0_25 = arith.constant 0 : index
    %c6_26 = arith.constant 6 : index
    %c0_27 = arith.constant 0 : index
    %73 = vector.load %arg4[%c0_25, %c6_26, %c0_27] : memref<2x27x22xf32, #tpu.memory_space<vmem>>, vector<1x16x22xf32>
    %74 = vector.shape_cast %73 : vector<1x16x22xf32> to vector<16x22xf32>
    %c7 = arith.constant 7 : index
    %75 = memref.load %arg1[%c7] : memref<99xf32, #tpu.memory_space<smem>>
    %76 = vector.broadcast %75 : f32 to vector<16x22xf32>
    %77 = arith.mulf %74, %76 : vector<16x22xf32>
    %78 = arith.addf %48, %77 : vector<16x22xf32>
    %c8_28 = arith.constant 8 : index
    %79 = memref.load %arg1[%c8_28] : memref<99xf32, #tpu.memory_space<smem>>
    %80 = vector.broadcast %79 : f32 to vector<16x22xf32>
    %81 = arith.mulf %74, %80 : vector<16x22xf32>
    %82 = arith.addf %52, %81 : vector<16x22xf32>
    %c9 = arith.constant 9 : index
    %83 = memref.load %arg1[%c9] : memref<99xf32, #tpu.memory_space<smem>>
    %84 = vector.broadcast %83 : f32 to vector<16x22xf32>
    %85 = arith.mulf %74, %84 : vector<16x22xf32>
    %86 = arith.addf %56, %85 : vector<16x22xf32>
    %c10 = arith.constant 10 : index
    %87 = memref.load %arg1[%c10] : memref<99xf32, #tpu.memory_space<smem>>
    %88 = vector.broadcast %87 : f32 to vector<16x22xf32>
    %89 = arith.mulf %74, %88 : vector<16x22xf32>
    %90 = arith.addf %60, %89 : vector<16x22xf32>
    %c11 = arith.constant 11 : index
    %91 = memref.load %arg1[%c11] : memref<99xf32, #tpu.memory_space<smem>>
    %92 = vector.broadcast %91 : f32 to vector<16x22xf32>
    %93 = arith.mulf %74, %92 : vector<16x22xf32>
    %94 = arith.addf %64, %93 : vector<16x22xf32>
    %c12 = arith.constant 12 : index
    %95 = memref.load %arg1[%c12] : memref<99xf32, #tpu.memory_space<smem>>
    %96 = vector.broadcast %95 : f32 to vector<16x22xf32>
    %97 = arith.mulf %74, %96 : vector<16x22xf32>
    %98 = arith.addf %68, %97 : vector<16x22xf32>
    %c13 = arith.constant 13 : index
    %99 = memref.load %arg1[%c13] : memref<99xf32, #tpu.memory_space<smem>>
    %100 = vector.broadcast %99 : f32 to vector<16x22xf32>
    %101 = arith.mulf %74, %100 : vector<16x22xf32>
    %102 = arith.addf %72, %101 : vector<16x22xf32>
    %c0_29 = arith.constant 0 : index
    %c7_30 = arith.constant 7 : index
    %c0_31 = arith.constant 0 : index
    %103 = vector.load %arg4[%c0_29, %c7_30, %c0_31] : memref<2x27x22xf32, #tpu.memory_space<vmem>>, vector<1x16x22xf32>
    %104 = vector.shape_cast %103 : vector<1x16x22xf32> to vector<16x22xf32>
    %c14 = arith.constant 14 : index
    %105 = memref.load %arg1[%c14] : memref<99xf32, #tpu.memory_space<smem>>
    %106 = vector.broadcast %105 : f32 to vector<16x22xf32>
    %107 = arith.mulf %104, %106 : vector<16x22xf32>
    %108 = arith.addf %78, %107 : vector<16x22xf32>
    %c15 = arith.constant 15 : index
    %109 = memref.load %arg1[%c15] : memref<99xf32, #tpu.memory_space<smem>>
    %110 = vector.broadcast %109 : f32 to vector<16x22xf32>
    %111 = arith.mulf %104, %110 : vector<16x22xf32>
    %112 = arith.addf %82, %111 : vector<16x22xf32>
    %c16 = arith.constant 16 : index
    %113 = memref.load %arg1[%c16] : memref<99xf32, #tpu.memory_space<smem>>
    %114 = vector.broadcast %113 : f32 to vector<16x22xf32>
    %115 = arith.mulf %104, %114 : vector<16x22xf32>
    %116 = arith.addf %86, %115 : vector<16x22xf32>
    %c17 = arith.constant 17 : index
    %117 = memref.load %arg1[%c17] : memref<99xf32, #tpu.memory_space<smem>>
    %118 = vector.broadcast %117 : f32 to vector<16x22xf32>
    %119 = arith.mulf %104, %118 : vector<16x22xf32>
    %120 = arith.addf %90, %119 : vector<16x22xf32>
    %c18 = arith.constant 18 : index
    %121 = memref.load %arg1[%c18] : memref<99xf32, #tpu.memory_space<smem>>
    %122 = vector.broadcast %121 : f32 to vector<16x22xf32>
    %123 = arith.mulf %104, %122 : vector<16x22xf32>
    %124 = arith.addf %94, %123 : vector<16x22xf32>
    %c19 = arith.constant 19 : index
    %125 = memref.load %arg1[%c19] : memref<99xf32, #tpu.memory_space<smem>>
    %126 = vector.broadcast %125 : f32 to vector<16x22xf32>
    %127 = arith.mulf %104, %126 : vector<16x22xf32>
    %128 = arith.addf %98, %127 : vector<16x22xf32>
    %c20 = arith.constant 20 : index
    %129 = memref.load %arg1[%c20] : memref<99xf32, #tpu.memory_space<smem>>
    %130 = vector.broadcast %129 : f32 to vector<16x22xf32>
    %131 = arith.mulf %104, %130 : vector<16x22xf32>
    %132 = arith.addf %102, %131 : vector<16x22xf32>
    %c0_32 = arith.constant 0 : index
    %c8_33 = arith.constant 8 : index
    %c0_34 = arith.constant 0 : index
    %133 = vector.load %arg4[%c0_32, %c8_33, %c0_34] : memref<2x27x22xf32, #tpu.memory_space<vmem>>, vector<1x16x22xf32>
    %134 = vector.shape_cast %133 : vector<1x16x22xf32> to vector<16x22xf32>
    %c21 = arith.constant 21 : index
    %135 = memref.load %arg1[%c21] : memref<99xf32, #tpu.memory_space<smem>>
    %136 = vector.broadcast %135 : f32 to vector<16x22xf32>
    %137 = arith.mulf %134, %136 : vector<16x22xf32>
    %138 = arith.addf %108, %137 : vector<16x22xf32>
    %c22 = arith.constant 22 : index
    %139 = memref.load %arg1[%c22] : memref<99xf32, #tpu.memory_space<smem>>
    %140 = vector.broadcast %139 : f32 to vector<16x22xf32>
    %141 = arith.mulf %134, %140 : vector<16x22xf32>
    %142 = arith.addf %112, %141 : vector<16x22xf32>
    %c23 = arith.constant 23 : index
    %143 = memref.load %arg1[%c23] : memref<99xf32, #tpu.memory_space<smem>>
    %144 = vector.broadcast %143 : f32 to vector<16x22xf32>
    %145 = arith.mulf %134, %144 : vector<16x22xf32>
    %146 = arith.addf %116, %145 : vector<16x22xf32>
    %c24 = arith.constant 24 : index
    %147 = memref.load %arg1[%c24] : memref<99xf32, #tpu.memory_space<smem>>
    %148 = vector.broadcast %147 : f32 to vector<16x22xf32>
    %149 = arith.mulf %134, %148 : vector<16x22xf32>
    %150 = arith.addf %120, %149 : vector<16x22xf32>
    %c25 = arith.constant 25 : index
    %151 = memref.load %arg1[%c25] : memref<99xf32, #tpu.memory_space<smem>>
    %152 = vector.broadcast %151 : f32 to vector<16x22xf32>
    %153 = arith.mulf %134, %152 : vector<16x22xf32>
    %154 = arith.addf %124, %153 : vector<16x22xf32>
    %c26 = arith.constant 26 : index
    %155 = memref.load %arg1[%c26] : memref<99xf32, #tpu.memory_space<smem>>
    %156 = vector.broadcast %155 : f32 to vector<16x22xf32>
    %157 = arith.mulf %134, %156 : vector<16x22xf32>
    %158 = arith.addf %128, %157 : vector<16x22xf32>
    %c27 = arith.constant 27 : index
    %159 = memref.load %arg1[%c27] : memref<99xf32, #tpu.memory_space<smem>>
    %160 = vector.broadcast %159 : f32 to vector<16x22xf32>
    %161 = arith.mulf %134, %160 : vector<16x22xf32>
    %162 = arith.addf %132, %161 : vector<16x22xf32>
    %c0_35 = arith.constant 0 : index
    %c9_36 = arith.constant 9 : index
    %c0_37 = arith.constant 0 : index
    %163 = vector.load %arg4[%c0_35, %c9_36, %c0_37] : memref<2x27x22xf32, #tpu.memory_space<vmem>>, vector<1x16x22xf32>
    %164 = vector.shape_cast %163 : vector<1x16x22xf32> to vector<16x22xf32>
    %c28 = arith.constant 28 : index
    %165 = memref.load %arg1[%c28] : memref<99xf32, #tpu.memory_space<smem>>
    %166 = vector.broadcast %165 : f32 to vector<16x22xf32>
    %167 = arith.mulf %164, %166 : vector<16x22xf32>
    %168 = arith.addf %138, %167 : vector<16x22xf32>
    %c29 = arith.constant 29 : index
    %169 = memref.load %arg1[%c29] : memref<99xf32, #tpu.memory_space<smem>>
    %170 = vector.broadcast %169 : f32 to vector<16x22xf32>
    %171 = arith.mulf %164, %170 : vector<16x22xf32>
    %172 = arith.addf %142, %171 : vector<16x22xf32>
    %c30 = arith.constant 30 : index
    %173 = memref.load %arg1[%c30] : memref<99xf32, #tpu.memory_space<smem>>
    %174 = vector.broadcast %173 : f32 to vector<16x22xf32>
    %175 = arith.mulf %164, %174 : vector<16x22xf32>
    %176 = arith.addf %146, %175 : vector<16x22xf32>
    %c31 = arith.constant 31 : index
    %177 = memref.load %arg1[%c31] : memref<99xf32, #tpu.memory_space<smem>>
    %178 = vector.broadcast %177 : f32 to vector<16x22xf32>
    %179 = arith.mulf %164, %178 : vector<16x22xf32>
    %180 = arith.addf %150, %179 : vector<16x22xf32>
    %c32 = arith.constant 32 : index
    %181 = memref.load %arg1[%c32] : memref<99xf32, #tpu.memory_space<smem>>
    %182 = vector.broadcast %181 : f32 to vector<16x22xf32>
    %183 = arith.mulf %164, %182 : vector<16x22xf32>
    %184 = arith.addf %154, %183 : vector<16x22xf32>
    %c33 = arith.constant 33 : index
    %185 = memref.load %arg1[%c33] : memref<99xf32, #tpu.memory_space<smem>>
    %186 = vector.broadcast %185 : f32 to vector<16x22xf32>
    %187 = arith.mulf %164, %186 : vector<16x22xf32>
    %188 = arith.addf %158, %187 : vector<16x22xf32>
    %c34 = arith.constant 34 : index
    %189 = memref.load %arg1[%c34] : memref<99xf32, #tpu.memory_space<smem>>
    %190 = vector.broadcast %189 : f32 to vector<16x22xf32>
    %191 = arith.mulf %164, %190 : vector<16x22xf32>
    %192 = arith.addf %162, %191 : vector<16x22xf32>
    %c0_38 = arith.constant 0 : index
    %c10_39 = arith.constant 10 : index
    %c0_40 = arith.constant 0 : index
    %193 = vector.load %arg4[%c0_38, %c10_39, %c0_40] : memref<2x27x22xf32, #tpu.memory_space<vmem>>, vector<1x16x22xf32>
    %194 = vector.shape_cast %193 : vector<1x16x22xf32> to vector<16x22xf32>
    %c35 = arith.constant 35 : index
    %195 = memref.load %arg1[%c35] : memref<99xf32, #tpu.memory_space<smem>>
    %196 = vector.broadcast %195 : f32 to vector<16x22xf32>
    %197 = arith.mulf %194, %196 : vector<16x22xf32>
    %198 = arith.addf %168, %197 : vector<16x22xf32>
    %c36 = arith.constant 36 : index
    %199 = memref.load %arg1[%c36] : memref<99xf32, #tpu.memory_space<smem>>
    %200 = vector.broadcast %199 : f32 to vector<16x22xf32>
    %201 = arith.mulf %194, %200 : vector<16x22xf32>
    %202 = arith.addf %172, %201 : vector<16x22xf32>
    %c37 = arith.constant 37 : index
    %203 = memref.load %arg1[%c37] : memref<99xf32, #tpu.memory_space<smem>>
    %204 = vector.broadcast %203 : f32 to vector<16x22xf32>
    %205 = arith.mulf %194, %204 : vector<16x22xf32>
    %206 = arith.addf %176, %205 : vector<16x22xf32>
    %c38 = arith.constant 38 : index
    %207 = memref.load %arg1[%c38] : memref<99xf32, #tpu.memory_space<smem>>
    %208 = vector.broadcast %207 : f32 to vector<16x22xf32>
    %209 = arith.mulf %194, %208 : vector<16x22xf32>
    %210 = arith.addf %180, %209 : vector<16x22xf32>
    %c39 = arith.constant 39 : index
    %211 = memref.load %arg1[%c39] : memref<99xf32, #tpu.memory_space<smem>>
    %212 = vector.broadcast %211 : f32 to vector<16x22xf32>
    %213 = arith.mulf %194, %212 : vector<16x22xf32>
    %214 = arith.addf %184, %213 : vector<16x22xf32>
    %c40 = arith.constant 40 : index
    %215 = memref.load %arg1[%c40] : memref<99xf32, #tpu.memory_space<smem>>
    %216 = vector.broadcast %215 : f32 to vector<16x22xf32>
    %217 = arith.mulf %194, %216 : vector<16x22xf32>
    %218 = arith.addf %188, %217 : vector<16x22xf32>
    %c41 = arith.constant 41 : index
    %219 = memref.load %arg1[%c41] : memref<99xf32, #tpu.memory_space<smem>>
    %220 = vector.broadcast %219 : f32 to vector<16x22xf32>
    %221 = arith.mulf %194, %220 : vector<16x22xf32>
    %222 = arith.addf %192, %221 : vector<16x22xf32>
    %c0_41 = arith.constant 0 : index
    %c11_42 = arith.constant 11 : index
    %c0_43 = arith.constant 0 : index
    %223 = vector.load %arg4[%c0_41, %c11_42, %c0_43] : memref<2x27x22xf32, #tpu.memory_space<vmem>>, vector<1x16x22xf32>
    %224 = vector.shape_cast %223 : vector<1x16x22xf32> to vector<16x22xf32>
    %c42 = arith.constant 42 : index
    %225 = memref.load %arg1[%c42] : memref<99xf32, #tpu.memory_space<smem>>
    %226 = vector.broadcast %225 : f32 to vector<16x22xf32>
    %227 = arith.mulf %224, %226 : vector<16x22xf32>
    %228 = arith.addf %198, %227 : vector<16x22xf32>
    %c43 = arith.constant 43 : index
    %229 = memref.load %arg1[%c43] : memref<99xf32, #tpu.memory_space<smem>>
    %230 = vector.broadcast %229 : f32 to vector<16x22xf32>
    %231 = arith.mulf %224, %230 : vector<16x22xf32>
    %232 = arith.addf %202, %231 : vector<16x22xf32>
    %c44 = arith.constant 44 : index
    %233 = memref.load %arg1[%c44] : memref<99xf32, #tpu.memory_space<smem>>
    %234 = vector.broadcast %233 : f32 to vector<16x22xf32>
    %235 = arith.mulf %224, %234 : vector<16x22xf32>
    %236 = arith.addf %206, %235 : vector<16x22xf32>
    %c45 = arith.constant 45 : index
    %237 = memref.load %arg1[%c45] : memref<99xf32, #tpu.memory_space<smem>>
    %238 = vector.broadcast %237 : f32 to vector<16x22xf32>
    %239 = arith.mulf %224, %238 : vector<16x22xf32>
    %240 = arith.addf %210, %239 : vector<16x22xf32>
    %c46 = arith.constant 46 : index
    %241 = memref.load %arg1[%c46] : memref<99xf32, #tpu.memory_space<smem>>
    %242 = vector.broadcast %241 : f32 to vector<16x22xf32>
    %243 = arith.mulf %224, %242 : vector<16x22xf32>
    %244 = arith.addf %214, %243 : vector<16x22xf32>
    %c47 = arith.constant 47 : index
    %245 = memref.load %arg1[%c47] : memref<99xf32, #tpu.memory_space<smem>>
    %246 = vector.broadcast %245 : f32 to vector<16x22xf32>
    %247 = arith.mulf %224, %246 : vector<16x22xf32>
    %248 = arith.addf %218, %247 : vector<16x22xf32>
    %c48 = arith.constant 48 : index
    %249 = memref.load %arg1[%c48] : memref<99xf32, #tpu.memory_space<smem>>
    %250 = vector.broadcast %249 : f32 to vector<16x22xf32>
    %251 = arith.mulf %224, %250 : vector<16x22xf32>
    %252 = arith.addf %222, %251 : vector<16x22xf32>
    %c1_44 = arith.constant 1 : index
    %c5_45 = arith.constant 5 : index
    %c0_46 = arith.constant 0 : index
    %253 = vector.load %arg4[%c1_44, %c5_45, %c0_46] : memref<2x27x22xf32, #tpu.memory_space<vmem>>, vector<1x16x22xf32>
    %254 = vector.shape_cast %253 : vector<1x16x22xf32> to vector<16x22xf32>
    %c49 = arith.constant 49 : index
    %255 = memref.load %arg1[%c49] : memref<99xf32, #tpu.memory_space<smem>>
    %256 = vector.broadcast %255 : f32 to vector<16x22xf32>
    %257 = arith.mulf %254, %256 : vector<16x22xf32>
    %258 = arith.addf %228, %257 : vector<16x22xf32>
    %c50 = arith.constant 50 : index
    %259 = memref.load %arg1[%c50] : memref<99xf32, #tpu.memory_space<smem>>
    %260 = vector.broadcast %259 : f32 to vector<16x22xf32>
    %261 = arith.mulf %254, %260 : vector<16x22xf32>
    %262 = arith.addf %232, %261 : vector<16x22xf32>
    %c51 = arith.constant 51 : index
    %263 = memref.load %arg1[%c51] : memref<99xf32, #tpu.memory_space<smem>>
    %264 = vector.broadcast %263 : f32 to vector<16x22xf32>
    %265 = arith.mulf %254, %264 : vector<16x22xf32>
    %266 = arith.addf %236, %265 : vector<16x22xf32>
    %c52 = arith.constant 52 : index
    %267 = memref.load %arg1[%c52] : memref<99xf32, #tpu.memory_space<smem>>
    %268 = vector.broadcast %267 : f32 to vector<16x22xf32>
    %269 = arith.mulf %254, %268 : vector<16x22xf32>
    %270 = arith.addf %240, %269 : vector<16x22xf32>
    %c53 = arith.constant 53 : index
    %271 = memref.load %arg1[%c53] : memref<99xf32, #tpu.memory_space<smem>>
    %272 = vector.broadcast %271 : f32 to vector<16x22xf32>
    %273 = arith.mulf %254, %272 : vector<16x22xf32>
    %274 = arith.addf %244, %273 : vector<16x22xf32>
    %c54 = arith.constant 54 : index
    %275 = memref.load %arg1[%c54] : memref<99xf32, #tpu.memory_space<smem>>
    %276 = vector.broadcast %275 : f32 to vector<16x22xf32>
    %277 = arith.mulf %254, %276 : vector<16x22xf32>
    %278 = arith.addf %248, %277 : vector<16x22xf32>
    %c55 = arith.constant 55 : index
    %279 = memref.load %arg1[%c55] : memref<99xf32, #tpu.memory_space<smem>>
    %280 = vector.broadcast %279 : f32 to vector<16x22xf32>
    %281 = arith.mulf %254, %280 : vector<16x22xf32>
    %282 = arith.addf %252, %281 : vector<16x22xf32>
    %c1_47 = arith.constant 1 : index
    %c6_48 = arith.constant 6 : index
    %c0_49 = arith.constant 0 : index
    %283 = vector.load %arg4[%c1_47, %c6_48, %c0_49] : memref<2x27x22xf32, #tpu.memory_space<vmem>>, vector<1x16x22xf32>
    %284 = vector.shape_cast %283 : vector<1x16x22xf32> to vector<16x22xf32>
    %c56 = arith.constant 56 : index
    %285 = memref.load %arg1[%c56] : memref<99xf32, #tpu.memory_space<smem>>
    %286 = vector.broadcast %285 : f32 to vector<16x22xf32>
    %287 = arith.mulf %284, %286 : vector<16x22xf32>
    %288 = arith.addf %258, %287 : vector<16x22xf32>
    %c57 = arith.constant 57 : index
    %289 = memref.load %arg1[%c57] : memref<99xf32, #tpu.memory_space<smem>>
    %290 = vector.broadcast %289 : f32 to vector<16x22xf32>
    %291 = arith.mulf %284, %290 : vector<16x22xf32>
    %292 = arith.addf %262, %291 : vector<16x22xf32>
    %c58 = arith.constant 58 : index
    %293 = memref.load %arg1[%c58] : memref<99xf32, #tpu.memory_space<smem>>
    %294 = vector.broadcast %293 : f32 to vector<16x22xf32>
    %295 = arith.mulf %284, %294 : vector<16x22xf32>
    %296 = arith.addf %266, %295 : vector<16x22xf32>
    %c59 = arith.constant 59 : index
    %297 = memref.load %arg1[%c59] : memref<99xf32, #tpu.memory_space<smem>>
    %298 = vector.broadcast %297 : f32 to vector<16x22xf32>
    %299 = arith.mulf %284, %298 : vector<16x22xf32>
    %300 = arith.addf %270, %299 : vector<16x22xf32>
    %c60 = arith.constant 60 : index
    %301 = memref.load %arg1[%c60] : memref<99xf32, #tpu.memory_space<smem>>
    %302 = vector.broadcast %301 : f32 to vector<16x22xf32>
    %303 = arith.mulf %284, %302 : vector<16x22xf32>
    %304 = arith.addf %274, %303 : vector<16x22xf32>
    %c61 = arith.constant 61 : index
    %305 = memref.load %arg1[%c61] : memref<99xf32, #tpu.memory_space<smem>>
    %306 = vector.broadcast %305 : f32 to vector<16x22xf32>
    %307 = arith.mulf %284, %306 : vector<16x22xf32>
    %308 = arith.addf %278, %307 : vector<16x22xf32>
    %c62 = arith.constant 62 : index
    %309 = memref.load %arg1[%c62] : memref<99xf32, #tpu.memory_space<smem>>
    %310 = vector.broadcast %309 : f32 to vector<16x22xf32>
    %311 = arith.mulf %284, %310 : vector<16x22xf32>
    %312 = arith.addf %282, %311 : vector<16x22xf32>
    %c1_50 = arith.constant 1 : index
    %c7_51 = arith.constant 7 : index
    %c0_52 = arith.constant 0 : index
    %313 = vector.load %arg4[%c1_50, %c7_51, %c0_52] : memref<2x27x22xf32, #tpu.memory_space<vmem>>, vector<1x16x22xf32>
    %314 = vector.shape_cast %313 : vector<1x16x22xf32> to vector<16x22xf32>
    %c63 = arith.constant 63 : index
    %315 = memref.load %arg1[%c63] : memref<99xf32, #tpu.memory_space<smem>>
    %316 = vector.broadcast %315 : f32 to vector<16x22xf32>
    %317 = arith.mulf %314, %316 : vector<16x22xf32>
    %318 = arith.addf %288, %317 : vector<16x22xf32>
    %c64 = arith.constant 64 : index
    %319 = memref.load %arg1[%c64] : memref<99xf32, #tpu.memory_space<smem>>
    %320 = vector.broadcast %319 : f32 to vector<16x22xf32>
    %321 = arith.mulf %314, %320 : vector<16x22xf32>
    %322 = arith.addf %292, %321 : vector<16x22xf32>
    %c65 = arith.constant 65 : index
    %323 = memref.load %arg1[%c65] : memref<99xf32, #tpu.memory_space<smem>>
    %324 = vector.broadcast %323 : f32 to vector<16x22xf32>
    %325 = arith.mulf %314, %324 : vector<16x22xf32>
    %326 = arith.addf %296, %325 : vector<16x22xf32>
    %c66 = arith.constant 66 : index
    %327 = memref.load %arg1[%c66] : memref<99xf32, #tpu.memory_space<smem>>
    %328 = vector.broadcast %327 : f32 to vector<16x22xf32>
    %329 = arith.mulf %314, %328 : vector<16x22xf32>
    %330 = arith.addf %300, %329 : vector<16x22xf32>
    %c67 = arith.constant 67 : index
    %331 = memref.load %arg1[%c67] : memref<99xf32, #tpu.memory_space<smem>>
    %332 = vector.broadcast %331 : f32 to vector<16x22xf32>
    %333 = arith.mulf %314, %332 : vector<16x22xf32>
    %334 = arith.addf %304, %333 : vector<16x22xf32>
    %c68 = arith.constant 68 : index
    %335 = memref.load %arg1[%c68] : memref<99xf32, #tpu.memory_space<smem>>
    %336 = vector.broadcast %335 : f32 to vector<16x22xf32>
    %337 = arith.mulf %314, %336 : vector<16x22xf32>
    %338 = arith.addf %308, %337 : vector<16x22xf32>
    %c69 = arith.constant 69 : index
    %339 = memref.load %arg1[%c69] : memref<99xf32, #tpu.memory_space<smem>>
    %340 = vector.broadcast %339 : f32 to vector<16x22xf32>
    %341 = arith.mulf %314, %340 : vector<16x22xf32>
    %342 = arith.addf %312, %341 : vector<16x22xf32>
    %c1_53 = arith.constant 1 : index
    %c8_54 = arith.constant 8 : index
    %c0_55 = arith.constant 0 : index
    %343 = vector.load %arg4[%c1_53, %c8_54, %c0_55] : memref<2x27x22xf32, #tpu.memory_space<vmem>>, vector<1x16x22xf32>
    %344 = vector.shape_cast %343 : vector<1x16x22xf32> to vector<16x22xf32>
    %c70 = arith.constant 70 : index
    %345 = memref.load %arg1[%c70] : memref<99xf32, #tpu.memory_space<smem>>
    %346 = vector.broadcast %345 : f32 to vector<16x22xf32>
    %347 = arith.mulf %344, %346 : vector<16x22xf32>
    %348 = arith.addf %318, %347 : vector<16x22xf32>
    %c71 = arith.constant 71 : index
    %349 = memref.load %arg1[%c71] : memref<99xf32, #tpu.memory_space<smem>>
    %350 = vector.broadcast %349 : f32 to vector<16x22xf32>
    %351 = arith.mulf %344, %350 : vector<16x22xf32>
    %352 = arith.addf %322, %351 : vector<16x22xf32>
    %c72 = arith.constant 72 : index
    %353 = memref.load %arg1[%c72] : memref<99xf32, #tpu.memory_space<smem>>
    %354 = vector.broadcast %353 : f32 to vector<16x22xf32>
    %355 = arith.mulf %344, %354 : vector<16x22xf32>
    %356 = arith.addf %326, %355 : vector<16x22xf32>
    %c73 = arith.constant 73 : index
    %357 = memref.load %arg1[%c73] : memref<99xf32, #tpu.memory_space<smem>>
    %358 = vector.broadcast %357 : f32 to vector<16x22xf32>
    %359 = arith.mulf %344, %358 : vector<16x22xf32>
    %360 = arith.addf %330, %359 : vector<16x22xf32>
    %c74 = arith.constant 74 : index
    %361 = memref.load %arg1[%c74] : memref<99xf32, #tpu.memory_space<smem>>
    %362 = vector.broadcast %361 : f32 to vector<16x22xf32>
    %363 = arith.mulf %344, %362 : vector<16x22xf32>
    %364 = arith.addf %334, %363 : vector<16x22xf32>
    %c75 = arith.constant 75 : index
    %365 = memref.load %arg1[%c75] : memref<99xf32, #tpu.memory_space<smem>>
    %366 = vector.broadcast %365 : f32 to vector<16x22xf32>
    %367 = arith.mulf %344, %366 : vector<16x22xf32>
    %368 = arith.addf %338, %367 : vector<16x22xf32>
    %c76 = arith.constant 76 : index
    %369 = memref.load %arg1[%c76] : memref<99xf32, #tpu.memory_space<smem>>
    %370 = vector.broadcast %369 : f32 to vector<16x22xf32>
    %371 = arith.mulf %344, %370 : vector<16x22xf32>
    %372 = arith.addf %342, %371 : vector<16x22xf32>
    %c1_56 = arith.constant 1 : index
    %c9_57 = arith.constant 9 : index
    %c0_58 = arith.constant 0 : index
    %373 = vector.load %arg4[%c1_56, %c9_57, %c0_58] : memref<2x27x22xf32, #tpu.memory_space<vmem>>, vector<1x16x22xf32>
    %374 = vector.shape_cast %373 : vector<1x16x22xf32> to vector<16x22xf32>
    %c77 = arith.constant 77 : index
    %375 = memref.load %arg1[%c77] : memref<99xf32, #tpu.memory_space<smem>>
    %376 = vector.broadcast %375 : f32 to vector<16x22xf32>
    %377 = arith.mulf %374, %376 : vector<16x22xf32>
    %378 = arith.addf %348, %377 : vector<16x22xf32>
    %c78 = arith.constant 78 : index
    %379 = memref.load %arg1[%c78] : memref<99xf32, #tpu.memory_space<smem>>
    %380 = vector.broadcast %379 : f32 to vector<16x22xf32>
    %381 = arith.mulf %374, %380 : vector<16x22xf32>
    %382 = arith.addf %352, %381 : vector<16x22xf32>
    %c79 = arith.constant 79 : index
    %383 = memref.load %arg1[%c79] : memref<99xf32, #tpu.memory_space<smem>>
    %384 = vector.broadcast %383 : f32 to vector<16x22xf32>
    %385 = arith.mulf %374, %384 : vector<16x22xf32>
    %386 = arith.addf %356, %385 : vector<16x22xf32>
    %c80 = arith.constant 80 : index
    %387 = memref.load %arg1[%c80] : memref<99xf32, #tpu.memory_space<smem>>
    %388 = vector.broadcast %387 : f32 to vector<16x22xf32>
    %389 = arith.mulf %374, %388 : vector<16x22xf32>
    %390 = arith.addf %360, %389 : vector<16x22xf32>
    %c81 = arith.constant 81 : index
    %391 = memref.load %arg1[%c81] : memref<99xf32, #tpu.memory_space<smem>>
    %392 = vector.broadcast %391 : f32 to vector<16x22xf32>
    %393 = arith.mulf %374, %392 : vector<16x22xf32>
    %394 = arith.addf %364, %393 : vector<16x22xf32>
    %c82 = arith.constant 82 : index
    %395 = memref.load %arg1[%c82] : memref<99xf32, #tpu.memory_space<smem>>
    %396 = vector.broadcast %395 : f32 to vector<16x22xf32>
    %397 = arith.mulf %374, %396 : vector<16x22xf32>
    %398 = arith.addf %368, %397 : vector<16x22xf32>
    %c83 = arith.constant 83 : index
    %399 = memref.load %arg1[%c83] : memref<99xf32, #tpu.memory_space<smem>>
    %400 = vector.broadcast %399 : f32 to vector<16x22xf32>
    %401 = arith.mulf %374, %400 : vector<16x22xf32>
    %402 = arith.addf %372, %401 : vector<16x22xf32>
    %c1_59 = arith.constant 1 : index
    %c10_60 = arith.constant 10 : index
    %c0_61 = arith.constant 0 : index
    %403 = vector.load %arg4[%c1_59, %c10_60, %c0_61] : memref<2x27x22xf32, #tpu.memory_space<vmem>>, vector<1x16x22xf32>
    %404 = vector.shape_cast %403 : vector<1x16x22xf32> to vector<16x22xf32>
    %c84 = arith.constant 84 : index
    %405 = memref.load %arg1[%c84] : memref<99xf32, #tpu.memory_space<smem>>
    %406 = vector.broadcast %405 : f32 to vector<16x22xf32>
    %407 = arith.mulf %404, %406 : vector<16x22xf32>
    %408 = arith.addf %378, %407 : vector<16x22xf32>
    %c85 = arith.constant 85 : index
    %409 = memref.load %arg1[%c85] : memref<99xf32, #tpu.memory_space<smem>>
    %410 = vector.broadcast %409 : f32 to vector<16x22xf32>
    %411 = arith.mulf %404, %410 : vector<16x22xf32>
    %412 = arith.addf %382, %411 : vector<16x22xf32>
    %c86 = arith.constant 86 : index
    %413 = memref.load %arg1[%c86] : memref<99xf32, #tpu.memory_space<smem>>
    %414 = vector.broadcast %413 : f32 to vector<16x22xf32>
    %415 = arith.mulf %404, %414 : vector<16x22xf32>
    %416 = arith.addf %386, %415 : vector<16x22xf32>
    %c87 = arith.constant 87 : index
    %417 = memref.load %arg1[%c87] : memref<99xf32, #tpu.memory_space<smem>>
    %418 = vector.broadcast %417 : f32 to vector<16x22xf32>
    %419 = arith.mulf %404, %418 : vector<16x22xf32>
    %420 = arith.addf %390, %419 : vector<16x22xf32>
    %c88 = arith.constant 88 : index
    %421 = memref.load %arg1[%c88] : memref<99xf32, #tpu.memory_space<smem>>
    %422 = vector.broadcast %421 : f32 to vector<16x22xf32>
    %423 = arith.mulf %404, %422 : vector<16x22xf32>
    %424 = arith.addf %394, %423 : vector<16x22xf32>
    %c89 = arith.constant 89 : index
    %425 = memref.load %arg1[%c89] : memref<99xf32, #tpu.memory_space<smem>>
    %426 = vector.broadcast %425 : f32 to vector<16x22xf32>
    %427 = arith.mulf %404, %426 : vector<16x22xf32>
    %428 = arith.addf %398, %427 : vector<16x22xf32>
    %c90 = arith.constant 90 : index
    %429 = memref.load %arg1[%c90] : memref<99xf32, #tpu.memory_space<smem>>
    %430 = vector.broadcast %429 : f32 to vector<16x22xf32>
    %431 = arith.mulf %404, %430 : vector<16x22xf32>
    %432 = arith.addf %402, %431 : vector<16x22xf32>
    %c1_62 = arith.constant 1 : index
    %c11_63 = arith.constant 11 : index
    %c0_64 = arith.constant 0 : index
    %433 = vector.load %arg4[%c1_62, %c11_63, %c0_64] : memref<2x27x22xf32, #tpu.memory_space<vmem>>, vector<1x16x22xf32>
    %434 = vector.shape_cast %433 : vector<1x16x22xf32> to vector<16x22xf32>
    %c91 = arith.constant 91 : index
    %435 = memref.load %arg1[%c91] : memref<99xf32, #tpu.memory_space<smem>>
    %436 = vector.broadcast %435 : f32 to vector<16x22xf32>
    %437 = arith.mulf %434, %436 : vector<16x22xf32>
    %438 = arith.addf %408, %437 : vector<16x22xf32>
    %c92 = arith.constant 92 : index
    %439 = memref.load %arg1[%c92] : memref<99xf32, #tpu.memory_space<smem>>
    %440 = vector.broadcast %439 : f32 to vector<16x22xf32>
    %441 = arith.mulf %434, %440 : vector<16x22xf32>
    %442 = arith.addf %412, %441 : vector<16x22xf32>
    %c93 = arith.constant 93 : index
    %443 = memref.load %arg1[%c93] : memref<99xf32, #tpu.memory_space<smem>>
    %444 = vector.broadcast %443 : f32 to vector<16x22xf32>
    %445 = arith.mulf %434, %444 : vector<16x22xf32>
    %446 = arith.addf %416, %445 : vector<16x22xf32>
    %c94 = arith.constant 94 : index
    %447 = memref.load %arg1[%c94] : memref<99xf32, #tpu.memory_space<smem>>
    %448 = vector.broadcast %447 : f32 to vector<16x22xf32>
    %449 = arith.mulf %434, %448 : vector<16x22xf32>
    %450 = arith.addf %420, %449 : vector<16x22xf32>
    %c95 = arith.constant 95 : index
    %451 = memref.load %arg1[%c95] : memref<99xf32, #tpu.memory_space<smem>>
    %452 = vector.broadcast %451 : f32 to vector<16x22xf32>
    %453 = arith.mulf %434, %452 : vector<16x22xf32>
    %454 = arith.addf %424, %453 : vector<16x22xf32>
    %c96 = arith.constant 96 : index
    %455 = memref.load %arg1[%c96] : memref<99xf32, #tpu.memory_space<smem>>
    %456 = vector.broadcast %455 : f32 to vector<16x22xf32>
    %457 = arith.mulf %434, %456 : vector<16x22xf32>
    %458 = arith.addf %428, %457 : vector<16x22xf32>
    %c97 = arith.constant 97 : index
    %459 = memref.load %arg1[%c97] : memref<99xf32, #tpu.memory_space<smem>>
    %460 = vector.broadcast %459 : f32 to vector<16x22xf32>
    %461 = arith.mulf %434, %460 : vector<16x22xf32>
    %462 = arith.addf %432, %461 : vector<16x22xf32>
    %463 = vector.extract_strided_slice %438 {offsets = [0, 0], sizes = [16, 16], strides = [1, 1]} : vector<16x22xf32> to vector<16x16xf32>
    %464 = vector.extract_strided_slice %442 {offsets = [0, 1], sizes = [16, 16], strides = [1, 1]} : vector<16x22xf32> to vector<16x16xf32>
    %465 = arith.addf %463, %464 : vector<16x16xf32>
    %466 = vector.extract_strided_slice %446 {offsets = [0, 2], sizes = [16, 16], strides = [1, 1]} : vector<16x22xf32> to vector<16x16xf32>
    %467 = arith.addf %465, %466 : vector<16x16xf32>
    %468 = vector.extract_strided_slice %450 {offsets = [0, 3], sizes = [16, 16], strides = [1, 1]} : vector<16x22xf32> to vector<16x16xf32>
    %469 = arith.addf %467, %468 : vector<16x16xf32>
    %470 = vector.extract_strided_slice %454 {offsets = [0, 4], sizes = [16, 16], strides = [1, 1]} : vector<16x22xf32> to vector<16x16xf32>
    %471 = arith.addf %469, %470 : vector<16x16xf32>
    %472 = vector.extract_strided_slice %458 {offsets = [0, 5], sizes = [16, 16], strides = [1, 1]} : vector<16x22xf32> to vector<16x16xf32>
    %473 = arith.addf %471, %472 : vector<16x16xf32>
    %474 = vector.extract_strided_slice %462 {offsets = [0, 6], sizes = [16, 16], strides = [1, 1]} : vector<16x22xf32> to vector<16x16xf32>
    %475 = arith.addf %473, %474 : vector<16x16xf32>
    %c98 = arith.constant 98 : index
    %476 = memref.load %arg1[%c98] : memref<99xf32, #tpu.memory_space<smem>>
    %477 = vector.broadcast %476 : f32 to vector<16x16xf32>
    %478 = arith.addf %475, %477 : vector<16x16xf32>
    %479 = arith.negf %478 : vector<16x16xf32>
    %480 = math.exp %479 : vector<16x16xf32>
    %cst_65 = arith.constant 1.000000e+00 : f32
    %481 = vector.broadcast %cst_65 : f32 to vector<16x16xf32>
    %482 = arith.addf %481, %480 : vector<16x16xf32>
    %483 = arith.divf %481, %482 : vector<16x16xf32>
    %c0_66 = arith.constant 0 : index
    %c0_67 = arith.constant 0 : index
    %c0_68 = arith.constant 0 : index
    %484 = vector.load %arg3[%c0_66, %c0_67, %c0_68] : memref<1x16x16xf32, #tpu.memory_space<vmem>>, vector<1x16x16xf32>
    %485 = vector.shape_cast %484 : vector<1x16x16xf32> to vector<16x16xf32>
    %486 = vector.shape_cast %483 : vector<16x16xf32> to vector<1x16x16xf32>
    tpu.vector_store %arg3[%c0_66, %c0_67, %c0_68], %486 {strides = array<i32>} : memref<1x16x16xf32, #tpu.memory_space<vmem>>, vector<1x16x16xf32>,
    return
  }
  func.func @transform_0(%arg0: i32) -> i32 {
    %c0_i32 = arith.constant 0 : i32
    %c0_i32_0 = arith.constant 0 : i32
    return %c0_i32 : i32
  }
  func.func @transform_1(%arg0: i32) -> (i32, i32, i32, i32) {
    %c0_i32 = arith.constant 0 : i32
    %c0_i32_0 = arith.constant 0 : i32
    %c0_i32_1 = arith.constant 0 : i32
    %c0_i32_2 = arith.constant 0 : i32
    return %arg0, %c0_i32, %c0_i32_0, %c0_i32_1 : i32, i32, i32, i32
  }
  func.func @transform_2(%arg0: i32) -> (i32, i32, i32) {
    %c0_i32 = arith.constant 0 : i32
    %c0_i32_0 = arith.constant 0 : i32
    %c0_i32_1 = arith.constant 0 : i32
    return %arg0, %c0_i32, %c0_i32_0 : i32, i32, i32
  }
}

</mosaic_0001>

<bundles_post_ra>
// kernel: tpu_custom_call.1
= control target key start
LH: loop header
LB: loop body
LE: loop exit
PB: predicated region body
PF: predicated region fallthrough
CT: control target
= control target key end

     0   :  { %s2370_s0 = inlined_call_operand.hbm [shape: f32[99], index: 0, kind: input, shape index: {}]   ;;  %s2371_s1 = inlined_call_operand.hbm [shape: f32[2,4,16,16], index: 1, kind: input, shape index: {}]   ;;  %s2372_s2 = inlined_call_operand.hbm [shape: f32[2,16,16], index: 2, kind: output, shape index: {}]  }
   0x1   :  { %2493 = sst [smem:[#allocation85_spill]] %s2370_s0 }
   0x2   :  { %2494 = sst [smem:[#allocation86_spill]] %s2371_s1 }
   0x3   :  { %2495 = sst [smem:[#allocation87_spill]] %s2372_s2 }
   0x4   :  { %7 = vsyncpa [#allocation6], 0 }
   0x5   :  { %8 = vsyncpa [#allocation4], 0 }
   0x6   :  { %10 = vsyncpa [#allocation4 + $0x1], 0 }
   0x7   :  { %11 = vsyncpa [#allocation5], 0 }
   0x8   :  { %13 = vsyncpa [#allocation5 + $0x1], 0  ;;  %s1356_s9 = smov 0   ;;  %s1358_s10 = smov 0  }
   0x9   :  { %s1360_s11 = smov 0   ;;  %s1362_s12 = smov 0  }
   0xa LB: > { %2496 = sst [smem:[#allocation12_spill]] %s1312_s9  ;;  %s1377_s13 = sadd.s32 4294967295, %s1324_s12   ;;  %s1324_s12 = sphi %s1362_s12, %s2802_s12   ;;  %s1320_s11 = sphi %s1360_s11, %s2805_s11   ;;  %s1316_s10 = sphi %s1358_s10, %s2804_s10   ;;  %s1312_s9 = sphi %s1356_s9, %s2803_s9  }
   0xb   : > { %2497 = sst [smem:[#allocation13_spill]] %s1316_s10  ;;  %s1022_s14 = sadd.s32 4294967294, %s1324_s12  }
   0xc   : > { %2498 = sst [smem:[#allocation14_spill]] %s1320_s11  ;;  %s1381_s15 = sadd.s32 1, %s1324_s12  }
   0xd   : > { %2499 = sst [smem:[#allocation15_spill]] %s1324_s12  ;;  %s47_s16 = sadd.s32 1, %s1320_s11 }
   0xe   : > { %2500 = sst [smem:[#allocation16_spill]] %s1377_s13  ;;  %s44_s17 = ssub.s32 %s1324_s12, %s1381_s15 }
   0xf   : > { %2501 = sst [smem:[#allocation17_spill]] %s1381_s15  ;;  %p54_p0 = scmp.ne.s32.totalorder %s1320_s11, %s1316_s10 }
  0x10   : > { %p45_p1 = scmp.eq.s32.totalorder %s44_s17, 0  ;;  %p55_p2 = scmp.eq.s32.totalorder %s1324_s12, 0 }
  0x11   : > { %p60_p3 = scmp.ne.s32.totalorder %s1316_s10, %s1312_s9  ;;  %p2373_p4 = scmp.eq.s32.totalorder %s1377_s13, 0 }
  0x12   : > { %s1393_s18 = scalar_select %p45_p1, %s1320_s11, %s47_s16  }
  0x13   : > { %p1395_p5 = por %p55_p2, %p54_p0  ;;  %p1401_p6 = por %p2373_p4, %p60_p3 }
  0x14   : > { %2502 = sst [smem:[#allocation18_spill]] %s1393_s18  ;;  %p84_p7 = scmp.eq.s32.totalorder %s1377_s13, 1 }
  0x15   : > { %s2504_s20 = scalar_select %p1401_p6, 1, 0 }
  0x16   : > { %p90_p8 = scmp.eq.s32.totalorder %s1022_s14, 1  ;;  %p1023_p9 = scmp.ge.s32.totalorder %s1324_s12, 1 }
  0x17   : > { %p97_p10 = scmp.lt.s32.totalorder %s1324_s12, 3  ;;  %p1408_p11 = por %p84_p7, %p54_p0 }
  0x18   : > { %p1412_p12 = por %p90_p8, %p60_p3  ;;  %p1161_p4 = scmp.lt.s32.totalorder %s1324_s12, 2 }
  0x19   : > { %s2505_s21 = scalar_select %p1408_p11, 1, 0 }
  0x1a   : > { %s2507_s22 = scalar_select %p1412_p12, 1, 0 }
  0x1b   : > { %2506 = sst [smem:[#allocation19_spill]] %s2505_s21  ;;  %p1416_p13 = pnand %p1023_p9, %p97_p10 }
  0x1c   : > { %2508 = sst [smem:[#allocation20_spill]] %s2507_s22  ;;  %s119_s24 = sand.u32 1, %s1320_s11  }
  0x1d   : > { %s2509_s23 = scalar_select %p1416_p13, 1, 0 }
  0x1e   : > { %p1148_p2 = pneg %p1416_p13  ;;  %s1138_s25 = sshll.u32 %s1324_s12, 10 }
  0x1f   : > { %p2510_p6 = scmp.eq.s32.totalorder %s1377_s13, 0  ;;  %p1430_p7 = pnand %p1161_p4, %p1395_p5 }
  0x20   : > { %s1026_s27 = sshll.u32 %s119_s24, 6  ;;  %s1326_s28 = smov [#allocation3]  }
  0x21   : > { %p1149_p0 = pnand %p1148_p2, %p2510_p6  ;;  %s2512_s0 = sld [smem:[#allocation85_spill]] }
  0x22   : > { %s2513_s1 = sld [smem:[#allocation86_spill]]  ;;  %s123_s6 = scalar_lea.vmem [#allocation7], %s1026_s27 }
  0x23   : > { %s130_s7 = sshll.u32 %s123_s6, 4  ;;  %s1444_s8 = scalar_lea.sflag [#allocation4], %s119_s24  ;;  %s1442_s7 = int_to_ptr.vmem [resolvable:$true] %s130_s7 }
  0x24   : > { %p1230_p4 = pneg %p1430_p7 }
  0x27   : > { %1151 = dma.hbm_to_smem (!%p1149_p0), %s2512_s0, 16, %s1326_s28, [#allocation6]  }
  0x28   : > { %s1440_s5 = scalar_lea.hbm %s2513_s1, %s1138_s25  ;;  %s1233_s19 = scalar_lea.hbm %s2513_s1, 2048 }
  0x29   : > { %s1228_s14 = scalar_lea.hbm %s1440_s5, 1024  ;;  %p1234_p8 = scmp.lt.s32.totalorder %s1440_s5, %s2513_s1 }
  0x2a   : > { %p1229_p3 = scmp.ne.s32.totalorder %s1440_s5, %s1228_s14  ;;  %p1235_p9 = scmp.lt.s32.totalorder %s1233_s19, %s1228_s14 }
  0x2c   : > { %p1231_p5 = pnand %p1230_p4, %p1229_p3  ;;  %p1236_p10 = por %p1235_p9, %p1234_p8 }
  0x2e   : > { %p1232_p6 = pneg %p1231_p5 }
  0x30   : > { %p1237_p2 = pnand %p1236_p10, %p1232_p6 }
  0x32   : > { %1240 = shalt.err (!%p1237_p2)
}
  0x33   : > { %s1241_s24 = scalar_lea.vmem %s1442_s7, 1024  ;;  %s1327_s27 = smov [#allocation7]  }
  0x34   : > { %p1242_p0 = scmp.ne.s32.totalorder %s1442_s7, %s1241_s24  ;;  %s1246_s29 = sshll.u32 %s1327_s27, 4  ;;  %s1247_s29 = int_to_ptr.vmem [resolvable:$false] %s1246_s29 }
  0x35   : > { %s1248_s30 = scalar_lea.vmem %s1247_s29, 2048  ;;  %p1249_p5 = scmp.lt.s32.totalorder %s1442_s7, %s1247_s29 }
  0x36   : > { %p1244_p1 = pnand %p1242_p0, %p1230_p4  ;;  %p1250_p12 = scmp.lt.s32.totalorder %s1248_s30, %s1241_s24 }
  0x38   : > { %p1245_p3 = pneg %p1244_p1  ;;  %p1251_p11 = por %p1250_p12, %p1249_p5 }
  0x3a   : > { %p1252_p13 = pnand %p1251_p11, %p1245_p3 }
  0x3c   : > { %1255 = shalt.err (!%p1252_p13)
}
  0x3d   : > { %s1328_s3 = smov 128   ;;  %s1329_s4 = smov 8  }
  0x3e   : > { %1155 = dma.hbm_to_vmem [thread:$0]  (!%p1430_p7), %s1440_s5, 1024, %s1442_s7, %s1444_s8, %s1328_s3, %s1328_s3, %s1329_s4  }
  0x3f   : > { %p2514_p4 = scmp.ne.s32.totalorder %s2509_s23, 0 }
  0x41   : > { %142 = sbr.rel (%p2514_p4) target bundleno = 510 (0x1fe), region = 28 }
  0x46   : > { %p2515_p1 = scmp.eq.s32.totalorder %s1377_s13, 0 }
  0x48   : > { %1299 = dma.done.wait (%p2515_p1), [#allocation6], 16   ;;  %p2516_p6 = pmov %p2515_p1 }
  0x49   : > { %s1472_s6 = sand.u32 1, %s1316_s10   ;;  %p2518_p11 = scmp.ne.s32.totalorder %s2504_s20, 0 }
  0x4a   : > { %1301 = vsyncadd (%p2516_p6), [#allocation6], 4294967280  ;;  %2517 = sst [smem:[#allocation21_spill]] %s1472_s6  ;;  %s1031_s14 = sshll.u32 %s1472_s6, 6 }
  0x4b   : > { %s149_s16 = scalar_lea.sflag [#allocation4], %s1472_s6  ;;  %s152_s17 = scalar_lea.vmem [#allocation7], %s1031_s14 }
  0x4c   : > { %1303 = dma.done.wait (%p2518_p11), %s149_s16, 1024  }
  0x4d   : > { %1305 = vsyncadd (%p2518_p11), %s149_s16, 4294966272 }
  0x4e   : > { %157 = sfence }
  0x4f   : > { %v184_v0 = vld [vmem:[%s152_s17] sm:$0xff]  ;;  %v186_v1 = vld [vmem:[%s152_s17 + $0x10] sm:$0xff]  ;;  %vm174_vm0 = vcmask 179200   ;;  %v185_v4 = vld [vmem:[%s152_s17 + $0x8] sm:$0xff]  ;;  %vm178_vm1 = vcmask 174080   ;;  %v1330_v11 = vmov 0.0  }
  0x50   : > { %v188_v2 = vld [vmem:[%s152_s17 + $0x20] sm:$0xff]  ;;  %v192_v3 = vmax.f32 %v184_v0, %v186_v1  ;;  %v187_v5 = vld [vmem:[%s152_s17 + $0x18] sm:$0xff]  ;;  %v194_v6 = vadd.f32 %v186_v1, %v184_v0  ;;  %v190_v7 = vld [vmem:[%s152_s17 + $0x30] sm:$0xff]  ;;  %175 = vst.msk [vmem:[#allocation2] sm:$0xff] %vm174_vm0, %v1330_v11  ;;  %s1331_s20 = smov 3   ;;  %s1486_s23 = sld [smem:[#allocation3 + $0x1]] }
  0x51   : > { %v189_v8 = vld [vmem:[%s152_s17 + $0x28] sm:$0xff]  ;;  %v193_v9 = vmax.f32 %v185_v4, %v187_v5  ;;  %v195_v10 = vadd.f32 %v187_v5, %v185_v4  ;;  %176 = vst.msk [vmem:[#allocation2 + $0x8] sm:$0xff] %vm174_vm0, %v1330_v11  ;;  %180 = vst.msk [vmem:[#allocation2 + $0x20] sm:$0xff] %vm174_vm0, %v1330_v11  ;;  %v191_v14 = vld [vmem:[%s152_s17 + $0x38] sm:$0xff]  ;;  %s1488_s26 = sld [smem:[#allocation3 + $0x8]]  ;;  %vm214_vm2 = vcmask 154648  }
  0x52   : > { %179 = vst.msk [vmem:[#allocation2 + $0x18] sm:$0x7] %vm178_vm1, %v1330_v11  ;;  %183 = vst.msk [vmem:[#allocation2 + $0x38] sm:$0x7] %vm178_vm1, %v1330_v11  ;;  %v196_v12 = vmax.f32 %v192_v3, %v188_v2  ;;  %v198_v13 = vadd.f32 %v194_v6, %v188_v2  ;;  %s1490_s5 = sld [smem:[#allocation3 + $0xf]]  ;;  %vm920_vm3 = vcmask 130048  }
  0x53   : > { %177 = vst.msk [vmem:[#allocation2 + $0x10] sm:$0xff] %vm174_vm0, %v1330_v11  ;;  %181 = vst.msk [vmem:[#allocation2 + $0x28] sm:$0xff] %vm174_vm0, %v1330_v11  ;;  %v197_v15 = vmax.f32 %v193_v9, %v189_v8  ;;  %v199_v16 = vadd.f32 %v195_v10, %v189_v8  ;;  %s1492_s7 = sld [smem:[#allocation3 + $0x16]] }
  0x54   : > { %182 = vst.msk [vmem:[#allocation2 + $0x30] sm:$0xff] %vm174_vm0, %v1330_v11  ;;  %v200_v17 = vmax.f32 %v196_v12, %v190_v7  ;;  %v202_v18 = vadd.f32 %v198_v13, %v190_v7  ;;  %s1494_s8 = sld [smem:[#allocation3 + $0x1d]] }
  0x55   : > { %v203_v19 = vadd.f32 %v199_v16, %v191_v14  ;;  %v201_v20 = vmax.f32 %v197_v15, %v191_v14  ;;  %s1496_s19 = sld [smem:[#allocation3 + $0x24]] }
  0x56   : > { %208 = vrot.lane.b32.xlu0 %v200_v17, %s1331_s20  ;;  %v204_v21 = vmul.f32 0.25, %v202_v18  ;;  %2519 = sst [smem:[#allocation22_spill]] %s1486_s23  ;;  %v237_v23 = vstv %s1486_s23 }
  0x57   : > { %v205_v22 = vmul.f32 0.25, %v203_v19  ;;  %2520 = sst [smem:[#allocation23_spill]] %s1488_s26  ;;  %v281_v24 = vstv %s1488_s26 }
  0x58   : > { %219 = vrot.lane.b32.xlu1 %v204_v21, %s1331_s20  ;;  %2521 = sst [smem:[#allocation24_spill]] %s1490_s5  ;;  %v325_v25 = vstv %s1490_s5 }
  0x59   : > { %2522 = sst [smem:[#allocation25_spill]] %s1492_s7  ;;  %v369_v26 = vstv %s1492_s7 }
  0x5a   : > { %210 = vrot.lane.b32.xlu0 %v201_v20, %s1331_s20  ;;  %2523 = sst [smem:[#allocation26_spill]] %s1494_s8  ;;  %v413_v27 = vstv %s1494_s8 }
  0x5b   : > { %2524 = sst [smem:[#allocation27_spill]] %s1496_s19  ;;  %v457_v28 = vstv %s1496_s19 }
  0x5c   : > { %221 = vrot.lane.b32.xlu1 %v205_v22, %s1331_s20  ;;  %s1498_s25 = sld [smem:[#allocation3 + $0x2b]] }
  0x5d   : > { %s1500_s28 = sld [smem:[#allocation3 + $0x32]] }
  0x5e   : > { %s1502_s24 = sld [smem:[#allocation3 + $0x39]] }
  0x5f   : > { %s1504_s27 = sld [smem:[#allocation3 + $0x40]] }
  0x60   : > { %s1506_s29 = sld [smem:[#allocation3 + $0x47]] }
  0x61   : > { %s1508_s30 = sld [smem:[#allocation3 + $0x4e]] }
  0x62   : > { %2525 = sst [smem:[#allocation28_spill]] %s1498_s25  ;;  %v501_v29 = vstv %s1498_s25 }
  0x63   : > { %2526 = sst [smem:[#allocation29_spill]] %s1500_s28  ;;  %v545_v30 = vstv %s1500_s28 }
  0x64   : > { %2527 = sst [smem:[#allocation30_spill]] %s1502_s24  ;;  %v589_v31 = vstv %s1502_s24 }
  0x65   : > { %2528 = sst [smem:[#allocation31_spill]] %s1504_s27  ;;  %v633_v32 = vstv %s1504_s27 }
  0x66   : > { %2529 = sst [smem:[#allocation32_spill]] %s1506_s29  ;;  %v677_v33 = vstv %s1506_s29 }
  0x67   : > { %2530 = sst [smem:[#allocation33_spill]] %s1508_s30  ;;  %v721_v34 = vstv %s1508_s30 }
  0x68   : > { %s1510_s3 = sld [smem:[#allocation3 + $0x55]] }
  0x69   : > { %s1512_s4 = sld [smem:[#allocation3 + $0x5c]] }
  0x6a   : > { %s1514_s14 = sld [smem:[#allocation3 + $0x2]] }
  0x6b   : > { %s1516_s16 = sld [smem:[#allocation3 + $0x9]] }
  0x6c   : > { %s1518_s17 = sld [smem:[#allocation3 + $0x10]] }
  0x6d   : > { %s1520_s20 = sld [smem:[#allocation3 + $0x17]] }
  0x6e   : > { %2531 = sst [smem:[#allocation34_spill]] %s1510_s3  ;;  %v765_v35 = vstv %s1510_s3 }
  0x6f   : > { %2532 = sst [smem:[#allocation35_spill]] %s1512_s4  ;;  %v809_v36 = vstv %s1512_s4 }
  0x70   : > { %s1522_s0 = sld [smem:[#allocation3 + $0x1e]]  ;;  %v243_v37 = vstv %s1514_s14 }
  0x71   : > { %2533 = sst [smem:[#allocation36_spill]] %s1516_s16  ;;  %v287_v38 = vstv %s1516_s16 }
  0x72   : > { %s1524_s1 = sld [smem:[#allocation3 + $0x25]]  ;;  %v331_v39 = vstv %s1518_s17 }
  0x73   : > { %2534 = sst [smem:[#allocation37_spill]] %s1520_s20  ;;  %v375_v40 = vstv %s1520_s20 }
  0x74   : > { %s1526_s18 = sld [smem:[#allocation3 + $0x2c]] }
  0x75   : > { %s1528_s11 = sld [smem:[#allocation3 + $0x33]] }
  0x76   : > { %2535 = sst [smem:[#allocation38_spill]] %s1522_s0  ;;  %v419_v41 = vstv %s1522_s0 }
  0x77   : > { %s1530_s10 = sld [smem:[#allocation3 + $0x3a]] }
  0x78   : > { %2536 = sst [smem:[#allocation39_spill]] %s1524_s1  ;;  %v2490_v42 = vstv %s1524_s1 }
  0x79   : > { %s1532_s15 = sld [smem:[#allocation3 + $0x41]] }
  0x7a   : > { %2537 = sst [smem:[#allocation40_spill]] %s1526_s18 }
  0x7b   : > { %2538 = sst [smem:[#allocation41_spill]] %s1528_s11 }
  0x7c   : > { %s1534_s12 = sld [smem:[#allocation3 + $0x48]] }
  0x7d   : > { %2539 = sst [smem:[#allocation42_spill]] %s1530_s10 }
  0x7e   : > { %s1536_s22 = sld [smem:[#allocation3 + $0x4f]] }
  0x7f   : > { %2540 = sst [smem:[#allocation43_spill]] %s1532_s15 }
  0x80   : > { %s1538_s9 = sld [smem:[#allocation3 + $0x56]] }
  0x81   : > { %s1540_s2 = sld [smem:[#allocation3 + $0x5d]] }
  0x82   : > { %2541 = sst [smem:[#allocation44_spill]] %s1534_s12 }
  0x83   : > { %s1542_s21 = sld [smem:[#allocation3 + $0x3]] }
  0x84   : > { %2542 = sst [smem:[#allocation45_spill]] %s1536_s22 }
  0x85   : > { %s1544_s13 = sld [smem:[#allocation3 + $0xa]] }
  0x86   : > { %2543 = sst [smem:[#allocation46_spill]] %s1538_s9 }
  0x87   : > { %2544 = sst [smem:[#allocation47_spill]] %s1540_s2 }
  0x88   : > { %s1546_s6 = sld [smem:[#allocation3 + $0x11]] }
  0x89   : > { %2545 = sst [smem:[#allocation48_spill]] %s1542_s21 }
  0x8a   : > { %s1548_s18 = sld [smem:[#allocation3 + $0x18]] }
  0x8b   : > { %2546 = sst [smem:[#allocation49_spill]] %s1544_s13 }
  0x8c   : > { %s1550_s11 = sld [smem:[#allocation3 + $0x1f]] }
  0x8d   : > { %s1552_s10 = sld [smem:[#allocation3 + $0x26]] }
  0x8e   : > { %2547 = sst [smem:[#allocation50_spill]] %s1546_s6 }
  0x8f   : > { %s1554_s15 = sld [smem:[#allocation3 + $0x2d]] }
  0x90   : > { %2548 = sst [smem:[#allocation51_spill]] %s1548_s18 }
  0x91   : > { %s1556_s12 = sld [smem:[#allocation3 + $0x34]] }
  0x92   : > { %2549 = sst [smem:[#allocation52_spill]] %s1550_s11 }
  0x93   : > { %2550 = sst [smem:[#allocation53_spill]] %s1552_s10 }
  0x94   : > { %s1558_s22 = sld [smem:[#allocation3 + $0x3b]] }
  0x95   : > { %2551 = sst [smem:[#allocation54_spill]] %s1554_s15 }
  0x96   : > { %s1560_s9 = sld [smem:[#allocation3 + $0x42]] }
  0x97   : > { %2552 = sst [smem:[#allocation55_spill]] %s1556_s12 }
  0x98   : > { %s1562_s2 = sld [smem:[#allocation3 + $0x49]] }
  0x99   : > { %s1564_s21 = sld [smem:[#allocation3 + $0x50]] }
  0x9a   : > { %2553 = sst [smem:[#allocation56_spill]] %s1558_s22 }
  0x9b   : > { %s1566_s13 = sld [smem:[#allocation3 + $0x57]] }
  0x9c   : > { %2554 = sst [smem:[#allocation57_spill]] %s1560_s9 }
  0x9d   : > { %s1568_s6 = sld [smem:[#allocation3 + $0x5e]] }
  0x9e   : > { %2555 = sst [smem:[#allocation58_spill]] %s1562_s2 }
  0x9f   : > { %2556 = sst [smem:[#allocation59_spill]] %s1564_s21 }
  0xa0   : > { %s1570_s18 = sld [smem:[#allocation3 + $0x4]] }
  0xa1   : > { %2557 = sst [smem:[#allocation60_spill]] %s1566_s13 }
  0xa2   : > { %s1572_s11 = sld [smem:[#allocation3 + $0xb]] }
  0xa3   : > { %2558 = sst [smem:[#allocation61_spill]] %s1568_s6 }
  0xa4   : > { %s1574_s10 = sld [smem:[#allocation3 + $0x12]] }
  0xa5   : > { %s1576_s15 = sld [smem:[#allocation3 + $0x19]] }
  0xa6   : > { %2559 = sst [smem:[#allocation62_spill]] %s1570_s18 }
  0xa7   : > { %s1578_s12 = sld [smem:[#allocation3 + $0x20]] }
  0xa8   : > { %2560 = sst [smem:[#allocation63_spill]] %s1572_s11 }
  0xa9   : > { %s1580_s22 = sld [smem:[#allocation3 + $0x27]] }
  0xaa   : > { %2561 = sst [smem:[#allocation64_spill]] %s1574_s10 }
  0xab   : > { %2562 = sst [smem:[#allocation65_spill]] %s1576_s15 }
  0xac   : > { %s1582_s2 = sld [smem:[#allocation3 + $0x2e]] }
  0xad   : > { %2563 = sst [smem:[#allocation66_spill]] %s1578_s12 }
  0xae   : > { %s1584_s21 = sld [smem:[#allocation3 + $0x35]] }
  0xaf   : > { %2564 = sst [smem:[#allocation67_spill]] %s1580_s22 }
  0xb0   : > { %s1586_s6 = sld [smem:[#allocation3 + $0x3c]] }
  0xb1   : > { %s1588_s18 = sld [smem:[#allocation3 + $0x43]] }
  0xb2   : > { %2565 = sst [smem:[#allocation68_spill]] %s1582_s2 }
  0xb3   : > { %s1590_s11 = sld [smem:[#allocation3 + $0x4a]] }
  0xb4   : > { %2566 = sst [smem:[#allocation69_spill]] %s1584_s21 }
  0xb5   : > { %s1592_s15 = sld [smem:[#allocation3 + $0x51]] }
  0xb6   : > { %2567 = sst [smem:[#allocation70_spill]] %s1586_s6 }
  0xb7   : > { %2568 = sst [smem:[#allocation71_spill]] %s1588_s18 }
  0xb8   : > { %s1594_s12 = sld [smem:[#allocation3 + $0x58]] }
  0xb9   : > { %2569 = sst [smem:[#allocation72_spill]] %s1590_s11 }
  0xba   : > { %s1596_s22 = sld [smem:[#allocation3 + $0x5f]] }
  0xbb   : > { %s1598_s2 = sld [smem:[#allocation3 + $0x5]] }
  0xbc   : > { %s1600_s21 = sld [smem:[#allocation3 + $0xc]] }
  0xbd   : > { %s1602_s6 = sld [smem:[#allocation3 + $0x13]] }
  0xbe   : > { %2570 = sst [smem:[#allocation73_spill]] %s1594_s12 }
  0xbf   : > { %s1604_s18 = sld [smem:[#allocation3 + $0x1a]] }
  0xc0   : > { %s1606_s11 = sld [smem:[#allocation3 + $0x21]] }
  0xc1   : > { %s1608_s12 = sld [smem:[#allocation3 + $0x28]] }
  0xc2   : > { %2571 = sst [smem:[#allocation74_spill]] %s1600_s21 }
  0xc3   : > { %s1614_s21 = sld [smem:[#allocation3 + $0x2f]] }
  0xc4   : > { %s2577_s23 = sld [smem:[#allocation41_spill]] }
  0xc5   : > { %s2578_s26 = sld [smem:[#allocation42_spill]] }
  0xc6   : > { %2572 = sst [smem:[#allocation75_spill]] %s1606_s11 }
  0xc7   : > { %2573 = sst [smem:[#allocation76_spill]] %s1608_s12 }
  0xc8   : > { %s1620_s11 = sld [smem:[#allocation3 + $0x36]]  ;;  %v209_v51 = vpop.permute.xlu0 %208 }
  0xc9   : > { %2574 = sst [smem:[#allocation77_spill]] %s1614_s21  ;;  %215 = vst.msk [vmem:[#allocation2 + $0x8] sm:$0xff] %vm214_vm2, %v209_v51 }
  0xca   : > { %s2576_s12 = sld [smem:[#allocation40_spill]]  ;;  %v2488_v44 = vstv %s2577_s23  ;;  %v220_v60 = vpop.permute.xlu1 %219 }
  0xcb   : > { %s2579_s5 = sld [smem:[#allocation43_spill]]  ;;  %v2489_v45 = vstv %s2578_s26  ;;  %226 = vst.msk [vmem:[#allocation2 + $0x28] sm:$0xff] %vm214_vm2, %v220_v60 }
  0xcc   : > { %s1626_s7 = sld [smem:[#allocation3 + $0x3d]]  ;;  %v211_v5 = vpop.permute.xlu0 %210 }
  0xcd   : > { %s2581_s21 = sld [smem:[#allocation44_spill]]  ;;  %216 = vst.msk [vmem:[#allocation2 + $0x10] sm:$0xff] %vm214_vm2, %v211_v5 }
  0xce   : > { %2575 = sst [smem:[#allocation78_spill]] %s1620_s11  ;;  %v222_v14 = vpop.permute.xlu1 %221 }
  0xcf   : > { %s1632_s28 = sld [smem:[#allocation3 + $0x44]]  ;;  %227 = vst.msk [vmem:[#allocation2 + $0x30] sm:$0xff] %vm214_vm2, %v222_v14 }
  0xd0   : > { %s1638_s11 = sld [smem:[#allocation3 + $0x4b]]  ;;  %v507_v43 = vstv %s2576_s12  ;;  %v1702_v51 = vld [vmem:[#allocation2 + $0x5] sm:$0xff] }
  0xd1   : > { %v639_v46 = vstv %s2579_s5  ;;  %s1644_s16 = sld [smem:[#allocation3 + $0x52]]  ;;  %v1704_v60 = vld [vmem:[#allocation2 + $0x6] sm:$0xff]  ;;  %v238_v15 = vmul.f32 %v237_v23, %v1702_v51  ;;  %v244_v21 = vmul.f32 %v243_v37, %v1702_v51 }
  0xd2   : > { %2580 = sst [smem:[#allocation79_spill]] %s1626_s7  ;;  %v1706_v5 = vld [vmem:[#allocation2 + $0x7] sm:$0xff]  ;;  %v282_v22 = vmul.f32 %v281_v24, %v1704_v60  ;;  %v288_v17 = vmul.f32 %v287_v38, %v1704_v60 }
  0xd3   : > { %v683_v47 = vstv %s2581_s21  ;;  %s1650_s1 = sld [smem:[#allocation3 + $0x59]]  ;;  %v1722_v13 = vld [vmem:[#allocation2 + $0x8] sm:$0xff]  ;;  %v326_v19 = vmul.f32 %v325_v25, %v1706_v5 }
  0xd4   : > { %s1656_s26 = sld [smem:[#allocation3 + $0x60]]  ;;  %v284_v12 = vadd.f32 %v282_v22, %v238_v15  ;;  %v1735_v9 = vld [vmem:[#allocation2 + $0xd] sm:$0xff]  ;;  %v290_v14 = vadd.f32 %v288_v17, %v244_v21  ;;  %v370_v10 = vmul.f32 %v369_v26, %v1722_v13  ;;  %v1749_v11 = vld [vmem:[#allocation2 + $0x25] sm:$0xff] }
  0xd5   : > { %2585 = sst [smem:[#allocation80_spill]] %s1632_s28  ;;  %v1737_v20 = vld [vmem:[#allocation2 + $0xe] sm:$0xff]  ;;  %v1751_v2 = vld [vmem:[#allocation2 + $0x26] sm:$0xff]  ;;  %v239_v1 = vmul.f32 %v237_v23, %v1735_v9  ;;  %v552_v58 = vmul.f32 %v2488_v44, %v1749_v11 }
  0xd6   : > { %2590 = sst [smem:[#allocation81_spill]] %s1638_s11  ;;  %v1739_v8 = vld [vmem:[#allocation2 + $0xf] sm:$0xff]  ;;  %v328_v7 = vadd.f32 %v326_v19, %v284_v12  ;;  %v283_v17 = vmul.f32 %v281_v24, %v1737_v20  ;;  %v332_v12 = vmul.f32 %v331_v39, %v1706_v5  ;;  %v1772_v0 = vld [vmem:[#allocation2 + $0x27] sm:$0xff] }
  0xd7   : > { %2594 = sst [smem:[#allocation82_spill]] %s1644_s16  ;;  %v1744_v16 = vld [vmem:[#allocation2 + $0x9] sm:$0xff]  ;;  %v327_v4 = vmul.f32 %v325_v25, %v1739_v8  ;;  %v1779_v62 = vld [vmem:[#allocation2 + $0x11] sm:$0xff] }
  0xd8   : > { %s2602_s21 = sld [smem:[#allocation62_spill]]  ;;  %v1759_v21 = vld [vmem:[#allocation2 + $0x10] sm:$0xff]  ;;  %v372_v6 = vadd.f32 %v370_v10, %v328_v7  ;;  %v414_v23 = vmul.f32 %v413_v27, %v1744_v16  ;;  %v1774_v24 = vld [vmem:[#allocation2 + $0x28] sm:$0xff]  ;;  %v285_v63 = vadd.f32 %v283_v17, %v239_v1  ;;  %v546_v7 = vmul.f32 %v545_v30, %v1749_v11 }
  0xd9   : > { %2597 = sst [smem:[#allocation83_spill]] %s1650_s1  ;;  %v1761_v22 = vld [vmem:[#allocation2 + $0xa] sm:$0xff]  ;;  %v590_v10 = vmul.f32 %v589_v31, %v1751_v2  ;;  %v334_v18 = vadd.f32 %v332_v12, %v290_v14  ;;  %v376_v1 = vmul.f32 %v375_v40, %v1722_v13  ;;  %v371_v59 = vmul.f32 %v369_v26, %v1759_v21  ;;  %v1802_v14 = vld [vmem:[#allocation2 + $0x12] sm:$0xff] }
  0xda   : > { %2601 = sst [smem:[#allocation84_spill]] %s1656_s26  ;;  %v1781_v15 = vld [vmem:[#allocation2 + $0xb] sm:$0xff]  ;;  %v416_v17 = vadd.f32 %v414_v23, %v372_v6  ;;  %v458_v25 = vmul.f32 %v457_v28, %v1761_v22  ;;  %v329_v61 = vadd.f32 %v327_v4, %v285_v63  ;;  %v634_v12 = vmul.f32 %v633_v32, %v1772_v0  ;;  %v1824_v55 = vld [vmem:[#allocation2 + $0x13] sm:$0xff] }
  0xdb   : > { %s1663_s8 = sld [smem:[#allocation3 + $0x6]]  ;;  %v1795_v19 = vld [vmem:[#allocation2 + $0x29] sm:$0xff]  ;;  %v678_v6 = vmul.f32 %v677_v33, %v1774_v24  ;;  %v596_v63 = vmul.f32 %v2489_v45, %v1751_v2  ;;  %v502_v4 = vmul.f32 %v501_v29, %v1781_v15  ;;  %v415_v56 = vmul.f32 %v413_v27, %v1779_v62  ;;  %v1860_v52 = vld [vmem:[#allocation2 + $0x31] sm:$0xff] }
  0xdc   : > { %s2608_s30 = sld [smem:[#allocation68_spill]]  ;;  %v1797_v3 = vld [vmem:[#allocation2 + $0x2a] sm:$0xff]  ;;  %v460_v26 = vadd.f32 %v458_v25, %v416_v17  ;;  %v373_v57 = vadd.f32 %v371_v59, %v329_v61  ;;  %v722_v44 = vmul.f32 %v721_v34, %v1795_v19  ;;  %v378_v25 = vadd.f32 %v376_v1, %v334_v18  ;;  %v1862_v48 = vld [vmem:[#allocation2 + $0x32] sm:$0xff] }
  0xdd   : > { %s1669_s23 = sld [smem:[#allocation3 + $0xd]]  ;;  %v1810_v23 = vld [vmem:[#allocation2 + $0x2b] sm:$0xff]  ;;  %v766_v17 = vmul.f32 %v765_v35, %v1797_v3  ;;  %v420_v45 = vmul.f32 %v419_v41, %v1744_v16  ;;  %v459_v54 = vmul.f32 %v457_v28, %v1802_v14  ;;  %v503_v1 = vmul.f32 %v501_v29, %v1824_v55 }
  0xde   : > { %s2613_s28 = sld [smem:[#allocation72_spill]]  ;;  %v1826_v50 = vld [vmem:[#allocation2 + $0x2d] sm:$0xff]  ;;  %v504_v59 = vadd.f32 %v502_v4, %v460_v26  ;;  %v1840_v27 = vmul.f32 %v809_v36, %v1810_v23  ;;  %v417_v61 = vadd.f32 %v415_v56, %v373_v57  ;;  %v464_v53 = vmul.f32 %v2490_v42, %v1761_v22 }
  0xdf   : > { %s1676_s4 = sld [smem:[#allocation3 + $0x14]]  ;;  %v1845_v49 = vld [vmem:[#allocation2 + $0x2e] sm:$0xff]  ;;  %v547_v26 = vmul.f32 %v545_v30, %v1826_v50  ;;  %v422_v4 = vadd.f32 %v420_v45, %v378_v25  ;;  %v245_v29 = vmul.f32 %v243_v37, %v1735_v9  ;;  %v289_v30 = vmul.f32 %v287_v38, %v1737_v20 }
  0xe0   : > { %s2616_s12 = sld [smem:[#allocation74_spill]]  ;;  %v1847_v18 = vld [vmem:[#allocation2 + $0x2f] sm:$0xff]  ;;  %v548_v56 = vadd.f32 %v546_v7, %v504_v59  ;;  %v461_v57 = vadd.f32 %v459_v54, %v417_v61  ;;  %v591_v45 = vmul.f32 %v589_v31, %v1845_v49  ;;  %v508_v25 = vmul.f32 %v507_v43, %v1781_v15 }
  0xe1   : > { %2605 = sst [smem:[#allocation62_spill]] %s1663_s8  ;;  %v1858_v28 = vld [vmem:[#allocation2 + $0x30] sm:$0xff]  ;;  %v635_v54 = vmul.f32 %v633_v32, %v1847_v18  ;;  %v466_v7 = vadd.f32 %v464_v53, %v422_v4  ;;  %v291_v42 = vadd.f32 %v289_v30, %v245_v29  ;;  %v333_v38 = vmul.f32 %v331_v39, %v1739_v8  ;;  %s1332_s8 = smov 127  }
  0xe2   : > { %s1682_s0 = sld [smem:[#allocation3 + $0x1b]]  ;;  %v592_v59 = vadd.f32 %v590_v10, %v548_v56  ;;  %v505_v61 = vadd.f32 %v503_v1, %v461_v57  ;;  %v1879_v37 = vld [vmem:[#allocation2 + $0x33] sm:$0xff]  ;;  %v679_v31 = vmul.f32 %v677_v33, %v1858_v28  ;;  %v723_v32 = vmul.f32 %v721_v34, %v1860_v52 }
  0xe3   : > { %2610 = sst [smem:[#allocation68_spill]] %s1669_s23  ;;  %v767_v53 = vmul.f32 %v765_v35, %v1862_v48  ;;  %v510_v10 = vadd.f32 %v508_v25, %v466_v7  ;;  %v335_v56 = vadd.f32 %v333_v38, %v291_v42  ;;  %v377_v39 = vmul.f32 %v375_v40, %v1759_v21 }
  0xe4   : > { %s2618_s5 = sld [smem:[#allocation75_spill]]  ;;  %v636_v1 = vadd.f32 %v634_v12, %v592_v59  ;;  %v549_v4 = vadd.f32 %v547_v26, %v505_v61  ;;  %v811_v33 = vmul.f32 %v809_v36, %v1879_v37  ;;  %v640_v34 = vmul.f32 %v639_v46, %v1772_v0 }
  0xe5   : > { %2614 = sst [smem:[#allocation72_spill]] %s1676_s4  ;;  %v554_v57 = vadd.f32 %v552_v58, %v510_v10  ;;  %v684_v35 = vmul.f32 %v683_v47, %v1774_v24  ;;  %v379_v26 = vadd.f32 %v377_v39, %v335_v56  ;;  %v421_v42 = vmul.f32 %v419_v41, %v1779_v62 }
  0xe6   : > { %s1689_s13 = sld [smem:[#allocation3 + $0x22]]  ;;  %v680_v29 = vadd.f32 %v678_v6, %v636_v1  ;;  %v593_v12 = vadd.f32 %v591_v45, %v549_v4 }
  0xe7   : > { %s2620_s19 = sld [smem:[#allocation76_spill]]  ;;  %v598_v40 = vadd.f32 %v596_v63, %v554_v57  ;;  %v423_v6 = vadd.f32 %v421_v42, %v379_v26 }
  0xe8   : > { %2617 = sst [smem:[#allocation74_spill]] %s1682_s0  ;;  %v724_v61 = vadd.f32 %v722_v44, %v680_v29  ;;  %v637_v38 = vadd.f32 %v635_v54, %v593_v12  ;;  %v509_v29 = vmul.f32 %v507_v43, %v1824_v55 }
  0xe9   : > { %s2621_s25 = sld [smem:[#allocation77_spill]]  ;;  %v642_v41 = vadd.f32 %v640_v34, %v598_v40 }
  0xea   : > { %s1695_s9 = sld [smem:[#allocation3 + $0x29]]  ;;  %v768_v57 = vadd.f32 %v766_v17, %v724_v61  ;;  %v681_v44 = vadd.f32 %v679_v31, %v637_v38 }
  0xeb   : > { %s2638_s0 = sld [smem:[#allocation41_spill]]  ;;  %v686_v34 = vadd.f32 %v684_v35, %v642_v41 }
  0xec   : > { %2619 = sst [smem:[#allocation75_spill]] %s1689_s13  ;;  %v812_v17 = vadd.f32 %v1840_v27, %v768_v57  ;;  %v725_v31 = vadd.f32 %v723_v32, %v681_v44 }
  0xed   : > { %s2645_s24 = sld [smem:[#allocation39_spill]] }
  0xee   : > { %s2649_s1 = sld [smem:[#allocation45_spill]]  ;;  %846 = vrot.lane.b32.xlu0 %v812_v17, %s1332_s8  ;;  %v769_v27 = vadd.f32 %v767_v53, %v725_v31  ;;  %v685_v17 = vmul.f32 %v683_v47, %v1858_v28 }
  0xef   : > { %s2650_s7 = sld [smem:[#allocation48_spill]] }
  0xf0   : > { %2625 = sst [smem:[#allocation76_spill]] %s1695_s9  ;;  %v813_v44 = vadd.f32 %v811_v33, %v769_v27 }
  0xf1   : > { %s2639_s9 = sld [smem:[#allocation42_spill]] }
  0xf2   : > { %s2651_s4 = sld [smem:[#allocation49_spill]]  ;;  %848 = vrot.lane.b32.xlu1 %v813_v44, %s1332_s8 }
  0xf3   : > { %s2652_s14 = sld [smem:[#allocation46_spill]]  ;;  %v2659_v45 = vstv %s2645_s24 }
  0xf4   : > { %s2653_s3 = sld [smem:[#allocation50_spill]]  ;;  %v2654_v30 = vstv %s2649_s1  ;;  %v465_v10 = vmul.f32 %v2659_v45, %v1802_v14  ;;  %v641_v45 = vmul.f32 %v639_v46, %v1847_v18  ;;  %v2682_v47 = vstv %s2649_s1 }
  0xf5   : > { %v728_v36 = vmul.f32 %v2654_v30, %v1795_v19  ;;  %v2655_v58 = vstv %s2650_s7  ;;  %s2657_s11 = sld [smem:[#allocation47_spill]] }
  0xf6   : > { %v250_v7 = vmul.f32 %v2655_v58, %v1702_v51  ;;  %s2658_s23 = sld [smem:[#allocation51_spill]]  ;;  %v467_v54 = vadd.f32 %v465_v10, %v423_v6  ;;  %v2666_v58 = vstv %s2638_s0 }
  0xf7   : > { %s1926_s27 = sld [smem:[#allocation3 + $0x30]]  ;;  %v553_v35 = vmul.f32 %v2666_v58, %v1826_v50 }
  0xf8   : > { %v2656_v25 = vstv %s2651_s4  ;;  %s2662_s17 = sld [smem:[#allocation52_spill]]  ;;  %v511_v43 = vadd.f32 %v509_v29, %v467_v54 }
  0xf9   : > { %v294_v59 = vmul.f32 %v2656_v25, %v1704_v60  ;;  %v2660_v63 = vstv %s2652_s14  ;;  %s1931_s10 = sld [smem:[#allocation3 + $0x37]]  ;;  %v2667_v25 = vstv %s2639_s9  ;;  %s1333_s9 = smov 126  }
  0xfa   : > { %v772_v1 = vmul.f32 %v2660_v63, %v1797_v3  ;;  %v2661_v56 = vstv %s2653_s3  ;;  %s2665_s29 = sld [smem:[#allocation53_spill]]  ;;  %v555_v32 = vadd.f32 %v553_v35, %v511_v43 }
  0xfb   : > { %v296_v4 = vadd.f32 %v294_v59, %v250_v7  ;;  %v338_v39 = vmul.f32 %v2661_v56, %v1706_v5  ;;  %v2663_v12 = vstv %s2657_s11  ;;  %s1939_s20 = sld [smem:[#allocation3 + $0x3e]]  ;;  %v730_v7 = vadd.f32 %v728_v36, %v686_v34 }
  0xfc   : > { %v816_v26 = vmul.f32 %v2663_v12, %v1810_v23  ;;  %v2664_v40 = vstv %s2658_s23  ;;  %s2668_s24 = sld [smem:[#allocation54_spill]]  ;;  %v597_v59 = vmul.f32 %v2667_v25, %v1845_v49  ;;  %v2680_v35 = vstv %s2658_s23 }
  0xfd   : > { %v340_v42 = vadd.f32 %v338_v39, %v296_v4  ;;  %v382_v30 = vmul.f32 %v2664_v40, %v1722_v13  ;;  %s2669_s16 = sld [smem:[#allocation55_spill]]  ;;  %v774_v41 = vadd.f32 %v772_v1, %v730_v7  ;;  %v2672_v4 = vstv %s2650_s7 }
  0xfe   : > { %v2670_v38 = vstv %s2662_s17  ;;  %v251_v56 = vmul.f32 %v2672_v4, %v1735_v9  ;;  %v2673_v39 = vstv %s2651_s4  ;;  %v599_v53 = vadd.f32 %v597_v59, %v555_v32  ;;  %s2677_s0 = sld [smem:[#allocation56_spill]] }
  0xff   : > { %v384_v61 = vadd.f32 %v382_v30, %v340_v42  ;;  %v426_v6 = vmul.f32 %v2670_v38, %v1744_v16  ;;  %v295_v57 = vmul.f32 %v2673_v39, %v1737_v20  ;;  %v818_v12 = vadd.f32 %v816_v26, %v774_v41  ;;  %s2678_s13 = sld [smem:[#allocation57_spill]] }
 0x100   : > { %v2671_v10 = vstv %s2665_s29  ;;  %v2676_v40 = vstv %s2653_s3  ;;  %v643_v33 = vadd.f32 %v641_v45, %v599_v53  ;;  %v531_v31 = vstv %s1926_s27  ;;  %s2679_s7 = sld [smem:[#allocation63_spill]]  ;;  %s1337_s27 = smov 122  }
 0x101   : > { %v470_v36 = vmul.f32 %v2671_v10, %v1761_v22  ;;  %v428_v63 = vadd.f32 %v426_v6, %v384_v61  ;;  %v297_v42 = vadd.f32 %v295_v57, %v251_v56  ;;  %v339_v30 = vmul.f32 %v2676_v40, %v1739_v8  ;;  %856 = vrot.lane.b32.xlu0 %v818_v12, %s1333_s9  ;;  %s2681_s4 = sld [smem:[#allocation58_spill]] }
 0x102   : > { %v2674_v54 = vstv %s2668_s24  ;;  %v575_v43 = vstv %s1931_s10  ;;  %v383_v7 = vmul.f32 %v2680_v35, %v1759_v21  ;;  %v619_v25 = vstv %s1939_s20  ;;  %s2684_s8 = sld [smem:[#allocation59_spill]] }
 0x103   : > { %v514_v46 = vmul.f32 %v2674_v54, %v1781_v15  ;;  %v2675_v29 = vstv %s2669_s16  ;;  %v472_v1 = vadd.f32 %v470_v36, %v428_v63  ;;  %v341_v58 = vadd.f32 %v339_v30, %v297_v42  ;;  %s2686_s26 = sld [smem:[#allocation64_spill]] }
 0x104   : > { %v558_v34 = vmul.f32 %v2675_v29, %v1749_v11  ;;  %v687_v59 = vadd.f32 %v685_v17, %v643_v33  ;;  %v729_v61 = vmul.f32 %v2682_v47, %v1860_v52  ;;  %v2683_v38 = vstv %s2652_s14  ;;  %s2688_s3 = sld [smem:[#allocation60_spill]] }
 0x105   : > { %v516_v26 = vadd.f32 %v514_v46, %v472_v1  ;;  %v773_v6 = vmul.f32 %v2683_v38, %v1862_v48  ;;  %v2685_v27 = vstv %s2677_s0  ;;  %v385_v10 = vadd.f32 %v383_v7, %v341_v58  ;;  %s2692_s1 = sld [smem:[#allocation61_spill]] }
 0x106   : > { %v602_v32 = vmul.f32 %v2685_v27, %v1751_v2  ;;  %v2687_v36 = vstv %s2662_s17  ;;  %v2689_v63 = vstv %s2602_s21  ;;  %v731_v56 = vadd.f32 %v729_v61, %v687_v59  ;;  %s2694_s14 = sld [smem:[#allocation65_spill]] }
 0x107   : > { %v560_v45 = vadd.f32 %v558_v34, %v516_v26  ;;  %v427_v41 = vmul.f32 %v2687_v36, %v1779_v62  ;;  %v256_v4 = vmul.f32 %v2689_v63, %v1702_v51  ;;  %v2690_v39 = vstv %s2657_s11  ;;  %s2699_s11 = sld [smem:[#allocation66_spill]] }
 0x108   : > { %v817_v57 = vmul.f32 %v2690_v39, %v1879_v37  ;;  %v2691_v44 = vstv %s2678_s13  ;;  %v2693_v54 = vstv %s2679_s7  ;;  %v2695_v34 = vstv %s2681_s4  ;;  %s2704_s23 = sld [smem:[#allocation67_spill]] }
 0x109   : > { %v646_v53 = vmul.f32 %v2691_v44, %v1772_v0  ;;  %v300_v46 = vmul.f32 %v2693_v54, %v1704_v60  ;;  %v604_v29 = vadd.f32 %v602_v32, %v560_v45  ;;  %v690_v12 = vmul.f32 %v2695_v34, %v1774_v24  ;;  %s2709_s17 = sld [smem:[#allocation69_spill]] }
 0x10a   : > { %v429_v1 = vadd.f32 %v427_v41, %v385_v10  ;;  %v2696_v42 = vstv %s2665_s29  ;;  %v775_v30 = vadd.f32 %v773_v6, %v731_v56  ;;  %v2697_v33 = vstv %s2684_s8  ;;  %s2719_s29 = sld [smem:[#allocation71_spill]] }
 0x10b   : > { %v471_v40 = vmul.f32 %v2696_v42, %v1802_v14  ;;  %v734_v17 = vmul.f32 %v2697_v33, %v1795_v19  ;;  %v302_v26 = vadd.f32 %v300_v46, %v256_v4  ;;  %v2698_v58 = vstv %s2686_s26  ;;  %s230_s10 = sld [smem:[#allocation3]] }
 0x10c   : > { %v344_v35 = vmul.f32 %v2698_v58, %v1706_v5  ;;  %v648_v7 = vadd.f32 %v646_v53, %v604_v29  ;;  %v2700_v59 = vstv %s2688_s3  ;;  %v2701_v38 = vstv %s2668_s24  ;;  %s2725_s24 = sld [smem:[#allocation73_spill]] }
 0x10d   : > { %v778_v47 = vmul.f32 %v2700_v59, %v1797_v3  ;;  %v473_v61 = vadd.f32 %v471_v40, %v429_v1  ;;  %v515_v27 = vmul.f32 %v2701_v38, %v1824_v55  ;;  %v819_v6 = vadd.f32 %v817_v57, %v775_v30  ;;  %s1039_s20 = sld [smem:[#allocation3 + $0x7]] }
 0x10e   : > { %v2702_v32 = vstv %s2692_s1  ;;  %v346_v10 = vadd.f32 %v344_v35, %v302_v26  ;;  %v2703_v36 = vstv %s2694_s14  ;;  %v692_v63 = vadd.f32 %v690_v12, %v648_v7 }
 0x10f   : > { %v822_v45 = vmul.f32 %v2702_v32, %v1810_v23  ;;  %v388_v41 = vmul.f32 %v2703_v36, %v1722_v13  ;;  %v517_v4 = vadd.f32 %v515_v27, %v473_v61  ;;  %v2705_v56 = vstv %s2669_s16  ;;  %858 = vrot.lane.b32.xlu1 %v819_v6, %s1333_s9  ;;  %s1334_s16 = smov 125   ;;  %s2766_s9 = sld [smem:[#allocation83_spill]] }
 0x110   : > { %v559_v39 = vmul.f32 %v2705_v56, %v1826_v50  ;;  %v2706_v44 = vstv %s2677_s0  ;;  %v2707_v54 = vstv %s2699_s11  ;;  %v2708_v29 = vstv %s2602_s21  ;;  %s2717_s21 = sld [smem:[#allocation70_spill]] }
 0x111   : > { %v603_v53 = vmul.f32 %v2706_v44, %v1845_v49  ;;  %v390_v57 = vadd.f32 %v388_v41, %v346_v10  ;;  %v432_v46 = vmul.f32 %v2707_v54, %v1744_v16  ;;  %v257_v34 = vmul.f32 %v2708_v29, %v1735_v9  ;;  %s2751_s0 = sld [smem:[#allocation79_spill]] }
 0x112   : > { %v2710_v12 = vstv %s2679_s7  ;;  %v736_v42 = vadd.f32 %v734_v17, %v692_v63  ;;  %v561_v40 = vadd.f32 %v559_v39, %v517_v4  ;;  %v2711_v30 = vstv %s2678_s13  ;;  %s2770_s13 = sld [smem:[#allocation75_spill]] }
 0x113   : > { %v301_v1 = vmul.f32 %v2710_v12, %v1737_v20  ;;  %v647_v33 = vmul.f32 %v2711_v30, %v1847_v18  ;;  %v2712_v26 = vstv %s2681_s4  ;;  %v434_v35 = vadd.f32 %v432_v46, %v390_v57  ;;  %s2195_s7 = sld [smem:[#allocation3 + $0x45]] }
 0x114   : > { %v691_v58 = vmul.f32 %v2712_v26, %v1858_v28  ;;  %v2713_v7 = vstv %s2704_s23  ;;  %v2714_v38 = vstv %s2686_s26  ;;  %v780_v17 = vadd.f32 %v778_v47, %v736_v42  ;;  %s2209_s4 = sld [smem:[#allocation3 + $0x4c]] }
 0x115   : > { %v476_v59 = vmul.f32 %v2713_v7, %v1761_v22  ;;  %v303_v61 = vadd.f32 %v301_v1, %v257_v34  ;;  %v345_v27 = vmul.f32 %v2714_v38, %v1739_v8  ;;  %v605_v6 = vadd.f32 %v603_v53, %v561_v40  ;;  %s2240_s26 = sld [smem:[#allocation3 + $0x5a]] }
 0x116   : > { %v2715_v32 = vstv %s2684_s8  ;;  %v2716_v36 = vstv %s2608_s30  ;;  %v2718_v4 = vstv %s2709_s17  ;;  %v2720_v44 = vstv %s2694_s14  ;;  %s2226_s8 = sld [smem:[#allocation3 + $0x53]] }
 0x117   : > { %v735_v10 = vmul.f32 %v2715_v32, %v1860_v52  ;;  %v520_v41 = vmul.f32 %v2716_v36, %v1781_v15  ;;  %v478_v63 = vadd.f32 %v476_v59, %v434_v35  ;;  %v564_v56 = vmul.f32 %v2718_v4, %v1749_v11  ;;  %s1046_s14 = sld [smem:[#allocation3 + $0xe]] }
 0x118   : > { %v347_v39 = vadd.f32 %v345_v27, %v303_v61  ;;  %v389_v57 = vmul.f32 %v2720_v44, %v1759_v21  ;;  %v824_v47 = vadd.f32 %v822_v45, %v780_v17  ;;  %v649_v53 = vadd.f32 %v647_v33, %v605_v6 }
 0x119   : > { %v2721_v54 = vstv %s2688_s3  ;;  %v2722_v29 = vstv %s2692_s1  ;;  %v522_v12 = vadd.f32 %v520_v41, %v478_v63  ;;  %v2723_v42 = vstv %s2699_s11  ;;  %s2249_s3 = sld [smem:[#allocation3 + $0x61]]  ;;  %s1336_s1 = smov 123  }
 0x11a   : > { %v779_v46 = vmul.f32 %v2721_v54, %v1862_v48  ;;  %v823_v34 = vmul.f32 %v2722_v29, %v1879_v37  ;;  %v391_v1 = vadd.f32 %v389_v57, %v347_v39  ;;  %v433_v40 = vmul.f32 %v2723_v42, %v1779_v62  ;;  %866 = vrot.lane.b32.xlu0 %v824_v47, %s1334_s16  ;;  %s1053_s11 = sld [smem:[#allocation3 + $0x15]] }
 0x11b   : > { %v2724_v30 = vstv %s1598_s2  ;;  %v693_v45 = vadd.f32 %v691_v58, %v649_v53  ;;  %v2726_v33 = vstv %s2717_s21  ;;  %v2727_v7 = vstv %s2719_s29 }
 0x11c   : > { %v262_v26 = vmul.f32 %v2724_v30, %v1702_v51  ;;  %v608_v35 = vmul.f32 %v2726_v33, %v1751_v2  ;;  %v652_v59 = vmul.f32 %v2727_v7, %v1772_v0  ;;  %v2728_v61 = vstv %s2616_s12 }
 0x11d   : > { %v306_v38 = vmul.f32 %v2728_v61, %v1704_v60  ;;  %v566_v27 = vadd.f32 %v564_v56, %v522_v12  ;;  %v2729_v17 = vstv %s2613_s28  ;;  %v435_v32 = vadd.f32 %v433_v40, %v391_v1 }
 0x11e   : > { %v696_v6 = vmul.f32 %v2729_v17, %v1774_v24  ;;  %v2730_v36 = vstv %s2704_s23  ;;  %v737_v41 = vadd.f32 %v735_v10, %v693_v45  ;;  %v2731_v63 = vstv %s1592_s15  ;;  %s1060_s23 = sld [smem:[#allocation3 + $0x1c]] }
 0x11f   : > { %v477_v58 = vmul.f32 %v2730_v36, %v1802_v14  ;;  %v740_v4 = vmul.f32 %v2731_v63, %v1795_v19  ;;  %v308_v39 = vadd.f32 %v306_v38, %v262_v26  ;;  %v2732_v44 = vstv %s1602_s6 }
 0x120   : > { %v350_v57 = vmul.f32 %v2732_v44, %v1706_v5  ;;  %v610_v56 = vadd.f32 %v608_v35, %v566_v27  ;;  %v2733_v47 = vstv %s2725_s24  ;;  %v2734_v29 = vstv %s2608_s30  ;;  %s2741_s30 = sld [smem:[#allocation78_spill]] }
 0x121   : > { %v784_v53 = vmul.f32 %v2733_v47, %v1797_v3  ;;  %v479_v54 = vadd.f32 %v477_v58, %v435_v32  ;;  %v521_v12 = vmul.f32 %v2734_v29, %v1824_v55  ;;  %v781_v10 = vadd.f32 %v779_v46, %v737_v41 }
 0x122   : > { %v2735_v1 = vstv %s1596_s22  ;;  %v352_v40 = vadd.f32 %v350_v57, %v308_v39  ;;  %v2736_v30 = vstv %s1604_s18  ;;  %v654_v45 = vadd.f32 %v652_v59, %v610_v56 }
 0x123   : > { %v828_v42 = vmul.f32 %v2735_v1, %v1810_v23  ;;  %v394_v26 = vmul.f32 %v2736_v30, %v1722_v13  ;;  %v523_v33 = vadd.f32 %v521_v12, %v479_v54  ;;  %v2737_v35 = vstv %s2709_s17  ;;  %s1067_s17 = sld [smem:[#allocation3 + $0x23]] }
 0x124   : > { %v565_v7 = vmul.f32 %v2737_v35, %v1826_v50  ;;  %v2738_v61 = vstv %s2618_s5  ;;  %v825_v27 = vadd.f32 %v823_v34, %v781_v10  ;;  %v2739_v17 = vstv %s1598_s2  ;;  %s2748_s2 = sld [smem:[#allocation62_spill]] }
 0x125   : > { %v438_v38 = vmul.f32 %v2738_v61, %v1744_v16  ;;  %v396_v46 = vadd.f32 %v394_v26, %v352_v40  ;;  %v263_v32 = vmul.f32 %v2739_v17, %v1735_v9  ;;  %v2740_v36 = vstv %s2616_s12  ;;  %s2749_s12 = sld [smem:[#allocation68_spill]] }
 0x126   : > { %v307_v58 = vmul.f32 %v2740_v36, %v1737_v20  ;;  %v698_v59 = vadd.f32 %v696_v6, %v654_v45  ;;  %v567_v41 = vadd.f32 %v565_v7, %v523_v33  ;;  %v2742_v63 = vstv %s2717_s21  ;;  %868 = vrot.lane.b32.xlu1 %v825_v27, %s1334_s16  ;;  %s1074_s21 = sld [smem:[#allocation3 + $0x2a]] }
 0x127   : > { %v609_v39 = vmul.f32 %v2742_v63, %v1845_v49  ;;  %v2743_v44 = vstv %s2719_s29  ;;  %v440_v34 = vadd.f32 %v438_v38, %v396_v46  ;;  %v2744_v56 = vstv %s2620_s19  ;;  %s2295_s29 = sld [smem:[#allocation3 + $0x31]] }
 0x128   : > { %v653_v57 = vmul.f32 %v2743_v44, %v1847_v18  ;;  %v482_v47 = vmul.f32 %v2744_v56, %v1761_v22  ;;  %v309_v54 = vadd.f32 %v307_v58, %v263_v32  ;;  %v2745_v6 = vstv %s1602_s6  ;;  %s2756_s6 = sld [smem:[#allocation80_spill]] }
 0x129   : > { %v351_v29 = vmul.f32 %v2745_v6, %v1739_v8  ;;  %v742_v12 = vadd.f32 %v740_v4, %v698_v59  ;;  %v611_v10 = vadd.f32 %v609_v39, %v567_v41  ;;  %v2746_v1 = vstv %s2613_s28  ;;  %s2757_s28 = sld [smem:[#allocation72_spill]] }
 0x12a   : > { %v697_v40 = vmul.f32 %v2746_v1, %v1858_v28  ;;  %v2747_v30 = vstv %s2621_s25  ;;  %v484_v45 = vadd.f32 %v482_v47, %v440_v34  ;;  %v2750_v33 = vstv %s2741_s30  ;;  %s1095_s16 = sld [smem:[#allocation3 + $0x3f]] }
 0x12b   : > { %v526_v26 = vmul.f32 %v2747_v30, %v1781_v15  ;;  %v570_v35 = vmul.f32 %v2750_v33, %v1749_v11  ;;  %v353_v7 = vadd.f32 %v351_v29, %v309_v54  ;;  %v2752_v61 = vstv %s1604_s18  ;;  %s2759_s18 = sld [smem:[#allocation81_spill]] }
 0x12c   : > { %v395_v38 = vmul.f32 %v2752_v61, %v1759_v21  ;;  %v786_v4 = vadd.f32 %v784_v53, %v742_v12  ;;  %v655_v27 = vadd.f32 %v653_v57, %v611_v10  ;;  %v2753_v46 = vstv %s1592_s15  ;;  %s2762_s15 = sld [smem:[#allocation82_spill]] }
 0x12d   : > { %v741_v17 = vmul.f32 %v2753_v46, %v1860_v52  ;;  %v2754_v32 = vstv %s2725_s24  ;;  %v2755_v58 = vstv %s1596_s22  ;;  %v528_v41 = vadd.f32 %v526_v26, %v484_v45  ;;  %s2764_s22 = sld [smem:[#allocation74_spill]] }
 0x12e   : > { %v785_v36 = vmul.f32 %v2754_v32, %v1862_v48  ;;  %v829_v59 = vmul.f32 %v2755_v58, %v1879_v37  ;;  %v397_v63 = vadd.f32 %v395_v38, %v353_v7  ;;  %v2758_v39 = vstv %s2618_s5  ;;  %s1335_s5 = smov 124   ;;  %s1088_s24 = sld [smem:[#allocation3 + $0x38]] }
 0x12f   : > { %v439_v44 = vmul.f32 %v2758_v39, %v1779_v62  ;;  %v830_v34 = vadd.f32 %v828_v42, %v786_v4  ;;  %v699_v53 = vadd.f32 %v697_v40, %v655_v27  ;;  %v2760_v57 = vstv %s2748_s2 }
 0x130   : > { %v268_v56 = vmul.f32 %v2760_v57, %v1702_v51  ;;  %v2761_v47 = vstv %s2749_s12  ;;  %v572_v6 = vadd.f32 %v570_v35, %v528_v41  ;;  %v2763_v29 = vstv %s2751_s0  ;;  %s1123_s0 = sld [smem:[#allocation3 + $0x5b]] }
 0x131   : > { %v312_v54 = vmul.f32 %v2761_v47, %v1704_v60  ;;  %v614_v12 = vmul.f32 %v2763_v29, %v1751_v2  ;;  %v441_v10 = vadd.f32 %v439_v44, %v397_v63  ;;  %v2765_v1 = vstv %s2620_s19  ;;  %876 = vrot.lane.b32.xlu0 %v830_v34, %s1335_s5  ;;  %s2774_s19 = sld [smem:[#allocation84_spill]] }
 0x132   : > { %v483_v30 = vmul.f32 %v2765_v1, %v1802_v14  ;;  %v743_v42 = vadd.f32 %v741_v17, %v699_v53  ;;  %v2767_v40 = vstv %s2756_s6  ;;  %v2768_v33 = vstv %s2757_s28 }
 0x133   : > { %v658_v26 = vmul.f32 %v2767_v40, %v1772_v0  ;;  %v314_v45 = vadd.f32 %v312_v54, %v268_v56  ;;  %v356_v35 = vmul.f32 %v2768_v33, %v1706_v5  ;;  %v616_v7 = vadd.f32 %v614_v12, %v572_v6 }
 0x134   : > { %v2769_v61 = vstv %s2759_s18  ;;  %v485_v4 = vadd.f32 %v483_v30, %v441_v10  ;;  %v2771_v27 = vstv %s2621_s25  ;;  %v787_v32 = vadd.f32 %v785_v36, %v743_v42  ;;  %s2776_s25 = sld [smem:[#allocation76_spill]] }
 0x135   : > { %v702_v38 = vmul.f32 %v2769_v61, %v1774_v24  ;;  %v527_v46 = vmul.f32 %v2771_v27, %v1824_v55  ;;  %v2772_v17 = vstv %s2762_s15  ;;  %v358_v41 = vadd.f32 %v356_v35, %v314_v45 }
 0x136   : > { %v746_v58 = vmul.f32 %v2772_v17, %v1795_v19  ;;  %v2773_v63 = vstv %s2764_s22  ;;  %v660_v44 = vadd.f32 %v658_v26, %v616_v7  ;;  %v2775_v34 = vstv %s2766_s9 }
 0x137   : > { %v400_v39 = vmul.f32 %v2773_v63, %v1722_v13  ;;  %v790_v53 = vmul.f32 %v2775_v34, %v1797_v3  ;;  %v529_v57 = vadd.f32 %v527_v46, %v485_v4  ;;  %v2777_v36 = vstv %s2741_s30  ;;  %s1102_s30 = sld [smem:[#allocation3 + $0x46]] }
 0x138   : > { %v571_v56 = vmul.f32 %v2777_v36, %v1826_v50  ;;  %v831_v47 = vadd.f32 %v829_v59, %v787_v32  ;;  %v2778_v54 = vmov %v2763_v29  ;;  %v2779_v12 = vstv %s2770_s13 }
 0x139   : > { %v615_v6 = vmul.f32 %v2778_v54, %v1845_v49  ;;  %v402_v29 = vadd.f32 %v400_v39, %v358_v41  ;;  %v444_v10 = vmul.f32 %v2779_v12, %v1744_v16  ;;  %v704_v1 = vadd.f32 %v702_v38, %v660_v44 }
 0x13a   : > { %v573_v30 = vadd.f32 %v571_v56, %v529_v57  ;;  %v2780_v42 = vstv %s2748_s2  ;;  %v2781_v59 = vstv %s2749_s12  ;;  %878 = vrot.lane.b32.xlu1 %v831_v47, %s1335_s5  ;;  %v2782_v45 = vstv %s2774_s19  ;;  %s1109_s2 = sld [smem:[#allocation3 + $0x4d]] }
 0x13b   : > { %v269_v40 = vmul.f32 %v2780_v42, %v1735_v9  ;;  %v313_v26 = vmul.f32 %v2781_v59, %v1737_v20  ;;  %v834_v33 = vmul.f32 %v2782_v45, %v1810_v23  ;;  %v2783_v35 = vstv %s2756_s6  ;;  %s1116_s12 = sld [smem:[#allocation3 + $0x54]] }
 0x13c   : > { %v659_v7 = vmul.f32 %v2783_v35, %v1847_v18  ;;  %v446_v61 = vadd.f32 %v444_v10, %v402_v29  ;;  %v2784_v38 = vstv %s2776_s25  ;;  %v748_v27 = vadd.f32 %v746_v58, %v704_v1  ;;  %s1130_s6 = sld [smem:[#allocation3 + $0x62]] }
 0x13d   : > { %v488_v4 = vmul.f32 %v2784_v38, %v1761_v22  ;;  %v617_v46 = vadd.f32 %v615_v6, %v573_v30  ;;  %v315_v32 = vadd.f32 %v313_v26, %v269_v40  ;;  %v2785_v17 = vstv %s2757_s28  ;;  %s2792_s28 = sld [smem:[#allocation21_spill]] }
 0x13e   : > { %v357_v41 = vmul.f32 %v2785_v17, %v1739_v8  ;;  %v2786_v63 = vstv %s2759_s18  ;;  %v532_v34 = vmul.f32 %v531_v31, %v1781_v15  ;;  %v576_v57 = vmul.f32 %v575_v43, %v1749_v11  ;;  %s2793_s18 = sld [smem:[#allocation16_spill]] }
 0x13f   : > { %v703_v39 = vmul.f32 %v2786_v63, %v1858_v28  ;;  %v490_v44 = vadd.f32 %v488_v4, %v446_v61  ;;  %v792_v36 = vadd.f32 %v790_v53, %v748_v27  ;;  %v661_v58 = vadd.f32 %v659_v7, %v617_v46  ;;  %s2795_s25 = sld [smem:[#allocation87_spill]] }
 0x140   : > { %v359_v56 = vadd.f32 %v357_v41, %v315_v32  ;;  %v2787_v47 = vstv %s2764_s22  ;;  %v2788_v6 = vstv %s2762_s15  ;;  %v663_v10 = vstv %s2195_s7  ;;  %s2794_s15 = sld [smem:[#allocation19_spill]] }
 0x141   : > { %v401_v54 = vmul.f32 %v2787_v47, %v1759_v21  ;;  %v747_v29 = vmul.f32 %v2788_v6, %v1860_v52  ;;  %v534_v12 = vadd.f32 %v532_v34, %v490_v44  ;;  %v836_v1 = vadd.f32 %v834_v33, %v792_v36 }
 0x142   : > { %v705_v30 = vadd.f32 %v703_v39, %v661_v58  ;;  %v2789_v42 = vstv %s2770_s13  ;;  %v620_v26 = vmul.f32 %v619_v25, %v1751_v2  ;;  %v707_v45 = vstv %s2209_s4 }
 0x143   : > { %v403_v53 = vadd.f32 %v401_v54, %v359_v56  ;;  %v445_v40 = vmul.f32 %v2789_v42, %v1779_v62  ;;  %v578_v59 = vadd.f32 %v576_v57, %v534_v12  ;;  %886 = vrot.lane.b32.xlu0 %v836_v1, %s1336_s1  ;;  %v2790_v33 = vstv %s2766_s9  ;;  %s1032_s22 = sshll.u32 %s2792_s28, 4 }
 0x144   : > { %v749_v35 = vadd.f32 %v747_v29, %v705_v30  ;;  %v791_v7 = vmul.f32 %v2790_v33, %v1862_v48  ;;  %v489_v4 = vmul.f32 %v2784_v38, %v1802_v14  ;;  %v664_v46 = vmul.f32 %v663_v10, %v1772_v0  ;;  %s173_s5 = scalar_lea.vmem [#allocation8], %s1032_s22  ;;  %s1139_s9 = sshll.u32 %s2793_s18, 8 }
 0x145   : > { %v447_v61 = vadd.f32 %v445_v40, %v403_v53  ;;  %v622_v27 = vadd.f32 %v620_v26, %v578_v59  ;;  %v751_v32 = vstv %s2226_s8  ;;  %v2791_v41 = vstv %s2774_s19  ;;  %s937_s13 = sshll.u32 %s173_s5, 4  ;;  %s2325_s4 = scalar_lea.hbm %s2795_s25, %s1139_s9  ;;  %s2327_s13 = int_to_ptr.vmem [resolvable:$true] %s937_s13 }
 0x146   : > { %v793_v17 = vadd.f32 %v791_v7, %v749_v35  ;;  %v835_v63 = vmul.f32 %v2791_v41, %v1879_v37  ;;  %v533_v44 = vmul.f32 %v531_v31, %v1824_v55  ;;  %v708_v57 = vmul.f32 %v707_v45, %v1774_v24  ;;  %s924_s8 = scalar_lea.sflag [#allocation5], %s2792_s28  ;;  %p2796_p13 = scmp.ne.s32.totalorder %s2794_s15, 0 }
 0x147   : > { %v491_v39 = vadd.f32 %v489_v4, %v447_v61  ;;  %v666_v34 = vadd.f32 %v664_v46, %v622_v27  ;;  %v795_v58 = vstv %s2240_s26  ;;  %v577_v47 = vmul.f32 %v575_v43, %v1826_v50  ;;  %s1256_s26 = scalar_lea.vmem %s2327_s13, 256 }
 0x148   : > { %v837_v36 = vadd.f32 %v835_v63, %v793_v17  ;;  %v752_v6 = vmul.f32 %v751_v32, %v1795_v19  ;;  %v839_v29 = vstv %s2249_s3  ;;  %v621_v1 = vmul.f32 %v619_v25, %v1845_v49  ;;  %p1257_p12 = scmp.ne.s32.totalorder %s2327_s13, %s1256_s26  ;;  %s1338_s3 = smov [#allocation8]  }
 0x149   : > { %v535_v56 = vadd.f32 %v533_v44, %v491_v39  ;;  %v710_v54 = vadd.f32 %v708_v57, %v666_v34  ;;  %v796_v31 = vmul.f32 %v795_v58, %v1797_v3  ;;  %v665_v42 = vmul.f32 %v663_v10, %v1847_v18 }
 0x14a   : > { %888 = vrot.lane.b32.xlu1 %v837_v36, %s1336_s1  ;;  %v840_v59 = vmul.f32 %v839_v29, %v1810_v23  ;;  %v709_v43 = vmul.f32 %v707_v45, %v1858_v28  ;;  %v753_v7 = vmul.f32 %v751_v32, %v1860_v52  ;;  %v797_v25 = vmul.f32 %v795_v58, %v1862_v48  ;;  %p1258_p7 = pnand %p1257_p12, %p2796_p13  ;;  %s1260_s1 = sshll.u32 %s1338_s3, 4  ;;  %s1261_s1 = int_to_ptr.vmem [resolvable:$false] %s1260_s1 }
 0x14b   : > { %v579_v12 = vadd.f32 %v577_v47, %v535_v56  ;;  %v754_v30 = vadd.f32 %v752_v6, %v710_v54  ;;  %v841_v4 = vmul.f32 %v839_v29, %v1879_v37  ;;  %v231_v10 = vstv %s230_s10  ;;  %p1263_p9 = scmp.lt.s32.totalorder %s2327_s13, %s1261_s1 }
 0x14c   : > { %v275_v46 = vstv %s1039_s20  ;;  %v232_v32 = vmul.f32 %v231_v10, %v1702_v51  ;;  %v319_v17 = vstv %s1046_s14  ;;  %v363_v39 = vstv %s1053_s11  ;;  %p1259_p8 = pneg %p1258_p7 }
 0x14d   : > { %v623_v53 = vadd.f32 %v621_v1, %v579_v12  ;;  %v798_v40 = vadd.f32 %v796_v31, %v754_v30  ;;  %v276_v45 = vmul.f32 %v275_v46, %v1704_v60  ;;  %v320_v63 = vmul.f32 %v319_v17, %v1706_v5 }
 0x14e   : > { %v277_v44 = vmul.f32 %v275_v46, %v1737_v20  ;;  %v233_v34 = vmul.f32 %v231_v10, %v1735_v9  ;;  %v364_v36 = vmul.f32 %v363_v39, %v1722_v13  ;;  %v407_v58 = vstv %s1060_s23 }
 0x14f   : > { %v667_v26 = vadd.f32 %v665_v42, %v623_v53  ;;  %v842_v35 = vadd.f32 %v840_v59, %v798_v40  ;;  %v278_v41 = vadd.f32 %v276_v45, %v232_v32  ;;  %v321_v51 = vmul.f32 %v319_v17, %v1739_v8 }
 0x150   : > { %v279_v56 = vadd.f32 %v277_v44, %v233_v34  ;;  %v408_v5 = vmul.f32 %v407_v58, %v1744_v16  ;;  %v451_v47 = vstv %s1067_s17  ;;  %v365_v20 = vmul.f32 %v363_v39, %v1759_v21 }
 0x151   : > { %v711_v33 = vadd.f32 %v709_v43, %v667_v26  ;;  %896 = vrot.lane.b32.xlu0 %v842_v35, %s1337_s27  ;;  %v322_v57 = vadd.f32 %v320_v63, %v278_v41  ;;  %v452_v9 = vmul.f32 %v451_v47, %v1761_v22  ;;  %v495_v29 = vstv %s1074_s21 }
 0x152   : > { %v323_v54 = vadd.f32 %v321_v51, %v279_v56  ;;  %v539_v1 = vstv %s2295_s29  ;;  %v409_v30 = vmul.f32 %v407_v58, %v1779_v62  ;;  %v496_v31 = vmul.f32 %v495_v29, %v1781_v15 }
 0x153   : > { %v755_v61 = vadd.f32 %v753_v7, %v711_v33  ;;  %v366_v60 = vadd.f32 %v364_v36, %v322_v57  ;;  %v540_v16 = vmul.f32 %v539_v1, %v1749_v11  ;;  %v453_v42 = vmul.f32 %v451_v47, %v1802_v14 }
 0x154   : > { %v367_v13 = vadd.f32 %v365_v20, %v323_v54  ;;  %v583_v40 = vstv %s1088_s24  ;;  %v497_v59 = vmul.f32 %v495_v29, %v1824_v55  ;;  %v627_v43 = vstv %s1095_s16 }
 0x155   : > { %v799_v38 = vadd.f32 %v797_v25, %v755_v61  ;;  %v410_v6 = vadd.f32 %v408_v5, %v366_v60  ;;  %v584_v26 = vmul.f32 %v583_v40, %v1751_v2  ;;  %v541_v33 = vmul.f32 %v539_v1, %v1826_v50 }
 0x156   : > { %v411_v8 = vadd.f32 %v409_v30, %v367_v13  ;;  %v628_v11 = vmul.f32 %v627_v43, %v1772_v0  ;;  %v671_v7 = vstv %s1102_s30  ;;  %v585_v25 = vmul.f32 %v583_v40, %v1845_v49 }
 0x157   : > { %v843_v27 = vadd.f32 %v841_v4, %v799_v38  ;;  %v454_v12 = vadd.f32 %v452_v9, %v410_v6  ;;  %v672_v38 = vmul.f32 %v671_v7, %v1774_v24  ;;  %v715_v55 = vstv %s1109_s2 }
 0x158   : > { %v455_v21 = vadd.f32 %v453_v42, %v411_v8  ;;  %v629_v46 = vmul.f32 %v627_v43, %v1847_v18  ;;  %v716_v50 = vmul.f32 %v715_v55, %v1795_v19  ;;  %v759_v45 = vstv %s1116_s12 }
 0x159   : > { %898 = vrot.lane.b32.xlu1 %v843_v27, %s1337_s27  ;;  %v498_v53 = vadd.f32 %v496_v31, %v454_v12  ;;  %v673_v17 = vmul.f32 %v671_v7, %v1858_v28  ;;  %v760_v49 = vmul.f32 %v759_v45, %v1797_v3  ;;  %v803_v24 = vstv %s1123_s0  ;;  %s1262_s27 = scalar_lea.vmem %s1261_s1, 512 }
 0x15a   : > { %v499_v62 = vadd.f32 %v497_v59, %v455_v21  ;;  %v717_v34 = vmul.f32 %v715_v55, %v1860_v52  ;;  %v804_v57 = vmul.f32 %v803_v24, %v1810_v23  ;;  %v761_v56 = vmul.f32 %v759_v45, %v1862_v48  ;;  %p1264_p10 = scmp.lt.s32.totalorder %s1262_s27, %s1256_s26 }
 0x15b   : > { %v542_v22 = vadd.f32 %v540_v16, %v498_v53  ;;  %v805_v3 = vmul.f32 %v803_v24, %v1879_v37  ;;  %v905_v29 = vstv %s1130_s6 }
 0x15c   : > { %v543_v14 = vadd.f32 %v541_v33, %v499_v62  ;;  %p1265_p2 = por %p1264_p10, %p1263_p9 }
 0x15d   : > { %v586_v35 = vadd.f32 %v584_v26, %v542_v22 }
 0x15e   : > { %v587_v2 = vadd.f32 %v585_v25, %v543_v14  ;;  %p1266_p0 = pnand %p1265_p2, %p1259_p8 }
 0x15f   : > { %v630_v61 = vadd.f32 %v628_v11, %v586_v35 }
 0x160   : > { %v847_v15 = vpop.permute.xlu0 %846  ;;  %v631_v0 = vadd.f32 %v629_v46, %v587_v2 }
 0x161   : > { %v674_v27 = vadd.f32 %v672_v38, %v630_v61 }
 0x162   : > { %v675_v39 = vadd.f32 %v673_v17, %v631_v0 }
 0x163   : > { %v718_v32 = vadd.f32 %v716_v50, %v674_v27 }
 0x164   : > { %v849_v10 = vpop.permute.xlu1 %848  ;;  %v719_v36 = vadd.f32 %v717_v34, %v675_v39 }
 0x165   : > { %v762_v44 = vadd.f32 %v760_v49, %v718_v32 }
 0x166   : > { %v763_v51 = vadd.f32 %v761_v56, %v719_v36 }
 0x167   : > { %v806_v58 = vadd.f32 %v804_v57, %v762_v44 }
 0x168   : > { %v807_v6 = vadd.f32 %v805_v3, %v763_v51 }
 0x169   : > { %v852_v60 = vadd.f32 %v847_v15, %v806_v58 }
 0x16a   : > { %v853_v52 = vadd.f32 %v849_v10, %v807_v6 }
 0x173   : > { %v857_v4 = vpop.permute.xlu0 %856 }
 0x174   : > { %v862_v28 = vadd.f32 %v857_v4, %v852_v60 }
 0x181   : > { %v859_v63 = vpop.permute.xlu1 %858 }
 0x182   : > { %v863_v23 = vadd.f32 %v859_v63, %v853_v52 }
 0x18c   : > { %v867_v41 = vpop.permute.xlu0 %866 }
 0x18d   : > { %v872_v47 = vadd.f32 %v867_v41, %v862_v28 }
 0x198   : > { %v869_v19 = vpop.permute.xlu1 %868 }
 0x199   : > { %v873_v30 = vadd.f32 %v869_v19, %v863_v23 }
 0x1a3   : > { %v877_v18 = vpop.permute.xlu0 %876 }
 0x1a4   : > { %v882_v20 = vadd.f32 %v877_v18, %v872_v47 }
 0x1ac   : > { %v879_v54 = vpop.permute.xlu1 %878 }
 0x1ad   : > { %v883_v31 = vadd.f32 %v879_v54, %v873_v30 }
 0x1b5   : > { %v887_v5 = vpop.permute.xlu0 %886 }
 0x1b6   : > { %v892_v9 = vadd.f32 %v887_v5, %v882_v20 }
 0x1bc   : > { %v889_v12 = vpop.permute.xlu1 %888 }
 0x1bd   : > { %v893_v16 = vadd.f32 %v889_v12, %v883_v31 }
 0x1c3   : > { %v897_v13 = vpop.permute.xlu0 %896 }
 0x1c4   : > { %v902_v1 = vadd.f32 %v897_v13, %v892_v9 }
 0x1c6   : > { %v906_v48 = vadd.f32 %v905_v29, %v902_v1 }
 0x1c8   : > { %v1131_v8 = vmul.f32 -1.442695, %v906_v48 }
 0x1ca   : > { %1209 = vpow2.f32 %v1131_v8 }
 0x1cb   : > { %v899_v37 = vpop.permute.xlu1 %898 }
 0x1cc   : > { %v903_v53 = vadd.f32 %v899_v37, %v893_v16 }
 0x1ce   : > { %v907_v42 = vadd.f32 %v905_v29, %v903_v53 }
 0x1d0   : > { %v1132_v40 = vmul.f32 -1.442695, %v907_v42 }
 0x1d2   : > { %1211 = vpow2.f32 %v1132_v40 }
 0x1d7   : > { %v1210_v21 = vpop.eup %1209 }
 0x1d8   : > { %v914_v22 = vadd.f32 1.0, %v1210_v21 }
 0x1da   : > { %1213 = vrcp.f32 %v914_v22 }
 0x1df   : > { %v1212_v59 = vpop.eup %1211 }
 0x1e0   : > { %v915_v26 = vadd.f32 1.0, %v1212_v59 }
 0x1e2   : > { %1215 = vrcp.f32 %v915_v26 }
 0x1e7   : > { %v1214_v43 = vpop.eup %1213 }
 0x1e8   : > { %921 = vst.msk [vmem:[%s173_s5] sm:$0xff] %vm920_vm3, %v1214_v43 }
 0x1ef   : > { %v1216_v62 = vpop.eup %1215 }
 0x1f0   : > { %922 = vst.msk [vmem:[%s173_s5 + $0x8] sm:$0xff] %vm920_vm3, %v1216_v62 }
 0x1f1   : > { %1269 = shalt.err (!%p1266_p0)
}
 0x1f2   : > { %s1270_s10 = scalar_lea.hbm %s2325_s4, 256  ;;  %s1274_s11 = scalar_lea.hbm %s2795_s25, 512 }
 0x1f3   : > { %p1271_p3 = scmp.ne.s32.totalorder %s2325_s4, %s1270_s10  ;;  %p1275_p1 = scmp.lt.s32.totalorder %s2325_s4, %s2795_s25 }
 0x1f4   : > { %p1276_p6 = scmp.lt.s32.totalorder %s1274_s11, %s1270_s10 }
 0x1f5   : > { %p1272_p5 = pnand %p1271_p3, %p2796_p13 }
 0x1f6   : > { %p1277_p11 = por %p1276_p6, %p1275_p1 }
 0x1f7   : > { %p1273_p4 = pneg %p1272_p5 }
 0x1f9   : > { %p1278_p12 = pnand %p1277_p11, %p1273_p4 }
 0x1fb   : > { %1281 = shalt.err (!%p1278_p12)
}
 0x1fc   : > { %s1339_s21 = smov 128   ;;  %s1340_s29 = smov 8  }
 0x1fd   : > { %1146 = dma.vmem_to_hbm [thread:$0]  (%p2796_p13), %s2327_s13, 256, %s2325_s4, %s924_s8, %s1339_s21, %s1339_s21, %s1340_s29  }
 0x1fe PF: > { %s2797_s24 = sld [smem:[#allocation12_spill]] }
 0x1ff   : > { %s2798_s16 = sld [smem:[#allocation20_spill]] }
 0x200   : > { %s2799_s30 = sld [smem:[#allocation15_spill]] }
 0x204   : > { %s952_s2 = sand.u32 1, %s2797_s24  }
 0x205   : > { %p2800_p7 = scmp.ne.s32.totalorder %s2798_s16, 0  ;;  %s953_s12 = scalar_lea.sflag [#allocation5], %s952_s2 }
 0x206   : > { %p2801_p8 = scmp.ge.s32.totalorder %s2799_s30, 2 }
 0x208   : > { %p1157_p9 = pnand %p2801_p8, %p2800_p7 }
 0x20a   : > { %p1158_p10 = pneg %p1157_p9 }
 0x20c   : > { %1307 = dma.done.wait (%p1158_p10), %s953_s12, 256  }
 0x20d   : > { %1309 = vsyncadd (%p1158_p10), %s953_s12, 4294967040  ;;  %s2802_s12 = sld [smem:[#allocation17_spill]] }
 0x20e   : > { %s2803_s9 = sld [smem:[#allocation13_spill]] }
 0x20f   : > { %s2804_s10 = sld [smem:[#allocation14_spill]] }
 0x210   : > { %s2805_s11 = sld [smem:[#allocation18_spill]] }
 0x213   : > { %p16_p2 = scmp.ge.s32.totalorder %s2802_s12, 4  }
 0x215   :  { %18 = sbr.rel (!%p16_p2) target bundleno = 10 (0xa), region = 79 }
 0x21a   :  { %958 = vsyncpa [#allocation4], 1 }
 0x21b   :  { %960 = vsyncpa [#allocation4 + $0x1], 1 }
 0x21c   :  { %961 = vsyncpa [#allocation5], 1 }
 0x21d   :  { %963 = vsyncpa [#allocation5 + $0x1], 1 }
 0x21e   :  { %964 = vsyncpa [#allocation6], 1 }
 0x21f   :  { %966 = vsyncpa [#allocation6 + $0x1], 1 }

</bundles_post_ra>
